<compile_context>
chip_gen: v7x
topology: tpu7x:2x2x1
jax: 0.10.0
libtpu: 0.0.40
codegen_flags: <defaults>
</compile_context>

<pallas_src>
import jax
import jax.numpy as jnp
from jax.experimental import pallas as pl
from jax.experimental.pallas import tpu as pltpu


def _up_transpose2d_kernel(xp_ref, w_ref, b_ref, o_ref):
    """One batch element per grid step (polyphase ConvTranspose2d k=3, s=2, p=1).

    xp_ref: (H+1, W+1, Cin)   bf16  input with one zero row/col appended (bottom/right)
    w_ref : (6, Cin, 2*Cout)  bf16  packed per-shift weight matrices (see wrapper)
    b_ref : (1, 2*Cout)       f32   bias duplicated for the two column phases
    o_ref : (H, 2, W, 2*Cout) bf16  packed phases:
            o[i, p, j, s*Cout + c] == convT_out[2*i + p, 2*j + s, c]
    """
    Hp, Wp, Cin = xp_ref.shape
    H, W = Hp - 1, Wp - 1
    C2 = w_ref.shape[2]

    # One un-shifted and one column-shifted slab; the row-sliced views below share them.
    xl = xp_ref[:, 0:W, :]           # (H+1, W, Cin)
    xs = xp_ref[:, 1:W + 1, :]       # (H+1, W, Cin)  single sublane-shifted load

    # Row slices on the outer dim are free; flatten M = H*W for dense 2-D MXU matmuls
    # (layout-free merge when W is a multiple of 8).
    x00 = xl[0:H].reshape(H * W, Cin)
    x10 = xl[1:H + 1].reshape(H * W, Cin)
    x01 = xs[0:H].reshape(H * W, Cin)
    x11 = xs[1:H + 1].reshape(H * W, Cin)

    def tap(x2d, wi):
        # (H*W, Cin) @ (Cin, 2*Cout) on the MXU with f32 accumulation.
        return jnp.dot(x2d, w_ref[wi], preferred_element_type=jnp.float32)

    bias2 = b_ref[...]                                       # (1, 2*Cout) f32

    # Even output rows: [even-col | odd-col] channel pairs per input pixel.
    even = tap(x00, 0) + tap(x01, 1) + bias2                 # (H*W, 2*Cout) f32
    o_ref[:, 0] = even.reshape(H, W, C2).astype(o_ref.dtype)

    # Odd output rows (even is dead by now -> fewer live f32 intermediates).
    odd = tap(x00, 2) + tap(x01, 3) + tap(x10, 4) + tap(x11, 5) + bias2
    o_ref[:, 1] = odd.reshape(H, W, C2).astype(o_ref.dtype)


def up_transpose2d(inp_t, ref_big, weight, bias):
    """Equivalent of Up(method='transpose2d', nf_in=Cin).forward(inp_t, ref_big).

    inp_t  : (N, Cin, H, W)        float32, NCHW (PyTorch convention)
    ref_big: (N, *, H_ref, W_ref)  only spatial dims are used
    weight : (Cin, Cout, 3, 3)     ConvTranspose2d weight (PyTorch layout)
    bias   : (Cout,)
    returns: (N, Cout, H_ref, W_ref) float32
    """
    N, Cin, H, W = inp_t.shape
    Cout = weight.shape[1]
    H_ref, W_ref = int(ref_big.shape[2]), int(ref_big.shape[3])

    # ---- glue (plain JAX): layout + dtype + weight packing ---------------------
    # The +1 zero row/col pad fuses into the same producer fusion as the NCHW->NHWC
    # transpose + bf16 cast (no separate HBM round trip for the pad).
    x = jnp.transpose(inp_t, (0, 2, 3, 1)).astype(jnp.bfloat16)         # NHWC bf16
    xp = jnp.pad(x, ((0, 0), (0, 1), (0, 1), (0, 0)))

    # Spatially flipped ConvTranspose2d weight; wf[kh, kw] is (Cin, Cout).
    wf = jnp.transpose(weight[:, :, ::-1, ::-1], (2, 3, 0, 1)).astype(jnp.bfloat16)
    zc = jnp.zeros((Cin, Cout), jnp.bfloat16)
    # Packed per-shift weights producing [even-col | odd-col] channel pairs.
    wcat = jnp.stack([
        jnp.concatenate([wf[1, 1], wf[1, 0]], axis=1),   # x00 -> even rows [ee|eo]
        jnp.concatenate([zc,       wf[1, 2]], axis=1),   # x01 -> even rows
        jnp.concatenate([wf[0, 1], wf[0, 0]], axis=1),   # x00 -> odd rows  [oe|oo]
        jnp.concatenate([zc,       wf[0, 2]], axis=1),   # x01 -> odd rows
        jnp.concatenate([wf[2, 1], wf[2, 0]], axis=1),   # x10 -> odd rows
        jnp.concatenate([zc,       wf[2, 2]], axis=1),   # x11 -> odd rows
    ], axis=0)                                           # (6, Cin, 2*Cout)
    b2 = jnp.concatenate([bias, bias]).reshape(1, 2 * Cout).astype(jnp.float32)

    # Rough per-step VMEM budget (tile-padded, double-buffered inputs/outputs) + headroom.
    def _ru(v, m):
        return -(-v // m) * m
    in_blk = (H + 1) * _ru(W + 1, 16) * _ru(Cin, 128) * 2
    out_blk = H * 2 * _ru(W, 16) * _ru(2 * Cout, 128) * 2
    w_blk = 6 * _ru(Cin, 16) * _ru(2 * Cout, 128) * 2 + 8 * 128 * 4
    interm = (6 * (H + 1) * _ru(W, 16) * _ru(Cin, 128) * 2
              + 4 * _ru(H * W, 8) * _ru(2 * Cout, 128) * 4)
    vmem_limit = int(min(100 * 2 ** 20,
                         max(32 * 2 ** 20,
                             2 * (2 * in_blk + 2 * out_blk + 2 * w_blk + interm))))

    out_packed = pl.pallas_call(
        _up_transpose2d_kernel,
        out_shape=jax.ShapeDtypeStruct((N, H, 2, W, 2 * Cout), jnp.bfloat16),
        grid_spec=pltpu.PrefetchScalarGridSpec(
            num_scalar_prefetch=0,
            grid=(N,),
            in_specs=[
                pl.BlockSpec((None, H + 1, W + 1, Cin), lambda n: (n, 0, 0, 0)),
                pl.BlockSpec((6, Cin, 2 * Cout), lambda n: (0, 0, 0)),
                pl.BlockSpec((1, 2 * Cout), lambda n: (0, 0)),
            ],
            out_specs=pl.BlockSpec((None, H, 2, W, 2 * Cout),
                                   lambda n: (n, 0, 0, 0, 0)),
        ),
        compiler_params=pltpu.CompilerParams(
            dimension_semantics=("parallel",),
            vmem_limit_bytes=vmem_limit),
    )(xp, wcat, b2)

    # Contiguous reshape -> full conv-transpose output grid (N, 2H, 2W, Cout); the
    # Up.forward crop / pad, the NHWC->NCHW transpose and the f32 cast fuse into one
    # XLA copy (the transpose is a full copy anyway).
    feat = out_packed.reshape(N, 2 * H, 2 * W, Cout)
    Hc, Wc = min(2 * H - 1, H_ref), min(2 * W - 1, W_ref)
    feat = feat[:, :Hc, :Wc, :]
    dh, dw = H_ref - Hc, W_ref - Wc
    feat = jnp.pad(feat, ((0, 0), (dh // 2, dh - dh // 2),
                          (dw // 2, dw - dw // 2), (0, 0)))
    return jnp.transpose(feat, (0, 3, 1, 2)).astype(jnp.float32)         # NCHW f32


def _reference_up_transpose2d(inp_t, ref_big, weight, bias):
    """Pure-JAX reference (lhs-dilated conv) using the same bf16-in / f32-acc path."""
    x_nhwc = jnp.transpose(inp_t, (0, 2, 3, 1)).astype(jnp.bfloat16)
    w_hwio = jnp.transpose(weight[:, :, ::-1, ::-1], (2, 3, 0, 1)).astype(jnp.bfloat16)
    feat = jax.lax.conv_general_dilated(
        x_nhwc, w_hwio, window_strides=(1, 1),
        padding=((1, 1), (1, 1)), lhs_dilation=(2, 2),
        dimension_numbers=("NHWC", "HWIO", "NHWC"),
        preferred_element_type=jnp.float32)
    feat = feat + bias[None, None, None, :].astype(jnp.float32)
    feat = jnp.transpose(feat, (0, 3, 1, 2))                             # NCHW
    Hr, Wr = int(ref_big.shape[2]), int(ref_big.shape[3])
    feat = feat[:, :, :Hr, :Wr]
    dh = max(Hr - feat.shape[2], 0)
    dw = max(Wr - feat.shape[3], 0)
    return jnp.pad(feat, ((0, 0), (0, 0),
                          (dh // 2, dh - dh // 2),
                          (dw // 2, dw - dw // 2)))


if __name__ == "__main__":
    key = jax.random.PRNGKey(0)
    k_x, k_r, k_w, k_b = jax.random.split(key, 4)

    N, Cin, H, W = 2, 4, 16, 16
    Cout = Cin // 2                                   # nf_in // 2
    Hr, Wr = 32, 32                                   # ref_big spatial size

    inp_t = jax.random.normal(k_x, (N, Cin, H, W), jnp.float32)
    ref_big = jax.random.normal(k_r, (N, Cout, Hr, Wr), jnp.float32)
    weight = 0.1 * jax.random.normal(k_w, (Cin, Cout, 3, 3), jnp.float32)
    bias = 0.1 * jax.random.normal(k_b, (Cout,), jnp.float32)

    up_fn = jax.jit(up_transpose2d)
    out = jax.block_until_ready(up_fn(inp_t, ref_big, weight, bias))

    ref = jax.block_until_ready(_reference_up_transpose2d(inp_t, ref_big, weight, bias))
    assert out.shape == (N, Cout, Hr, Wr), out.shape
    # Tolerance accounts for the bf16 output store (f32 accumulation in-kernel).
    assert jnp.allclose(out, ref, rtol=1e-2, atol=1e-2), \
        float(jnp.max(jnp.abs(out - ref)))

    print("KERNEL_OK")
</pallas_src>

<mosaic_0001>
module attributes {stable_mosaic.version = 11 : i64} {
  func.func @_up_transpose2d_kernel(%arg0: i32, %arg1: memref<1x17x17x4xbf16, #tpu.memory_space<vmem>>, %arg2: memref<6x4x4xbf16, #tpu.memory_space<vmem>>, %arg3: memref<1x4xf32, #tpu.memory_space<vmem>>, %arg4: memref<1x16x2x16x4xbf16, #tpu.memory_space<vmem>>) attributes {dimension_semantics = [#tpu.dimension_semantics<parallel>], iteration_bounds = array<i64: 2>, scalar_prefetch = 0 : i64, scratch_operands = 0 : i64, tpu.core_type = #tpu.core_type<tc>, window_params = [{transform_indices = @transform_0, window_bounds = array<i64: 1, 17, 17, 4>}, {pipeline_mode = #tpu.pipeline_mode<synchronous>, transform_indices = @transform_1, window_bounds = array<i64: 6, 4, 4>}, {pipeline_mode = #tpu.pipeline_mode<synchronous>, transform_indices = @transform_2, window_bounds = array<i64: 1, 4>}, {transform_indices = @transform_3, window_bounds = array<i64: 1, 16, 2, 16, 4>}]} {
    %c0 = arith.constant 0 : index
    %c0_0 = arith.constant 0 : index
    %c0_1 = arith.constant 0 : index
    %c0_2 = arith.constant 0 : index
    %0 = vector.load %arg1[%c0, %c0_0, %c0_1, %c0_2] : memref<1x17x17x4xbf16, #tpu.memory_space<vmem>>, vector<1x17x16x4xbf16>
    %1 = vector.shape_cast %0 : vector<1x17x16x4xbf16> to vector<17x16x4xbf16>
    %c0_3 = arith.constant 0 : index
    %c0_4 = arith.constant 0 : index
    %c1 = arith.constant 1 : index
    %c0_5 = arith.constant 0 : index
    %2 = vector.load %arg1[%c0_3, %c0_4, %c1, %c0_5] : memref<1x17x17x4xbf16, #tpu.memory_space<vmem>>, vector<1x17x16x4xbf16>
    %3 = vector.shape_cast %2 : vector<1x17x16x4xbf16> to vector<17x16x4xbf16>
    %4 = vector.extract_strided_slice %1 {offsets = [0, 0, 0], sizes = [16, 16, 4], strides = [1, 1, 1]} : vector<17x16x4xbf16> to vector<16x16x4xbf16>
    %5 = vector.shape_cast %4 : vector<16x16x4xbf16> to vector<256x4xbf16>
    %6 = vector.extract_strided_slice %1 {offsets = [1, 0, 0], sizes = [16, 16, 4], strides = [1, 1, 1]} : vector<17x16x4xbf16> to vector<16x16x4xbf16>
    %7 = vector.shape_cast %6 : vector<16x16x4xbf16> to vector<256x4xbf16>
    %8 = vector.extract_strided_slice %3 {offsets = [0, 0, 0], sizes = [16, 16, 4], strides = [1, 1, 1]} : vector<17x16x4xbf16> to vector<16x16x4xbf16>
    %9 = vector.shape_cast %8 : vector<16x16x4xbf16> to vector<256x4xbf16>
    %10 = vector.extract_strided_slice %3 {offsets = [1, 0, 0], sizes = [16, 16, 4], strides = [1, 1, 1]} : vector<17x16x4xbf16> to vector<16x16x4xbf16>
    %11 = vector.shape_cast %10 : vector<16x16x4xbf16> to vector<256x4xbf16>
    %c0_6 = arith.constant 0 : index
    %c0_7 = arith.constant 0 : index
    %12 = vector.load %arg3[%c0_6, %c0_7] : memref<1x4xf32, #tpu.memory_space<vmem>>, vector<1x4xf32>
    %c0_8 = arith.constant 0 : index
    %c0_9 = arith.constant 0 : index
    %c0_10 = arith.constant 0 : index
    %13 = vector.load %arg2[%c0_8, %c0_9, %c0_10] : memref<6x4x4xbf16, #tpu.memory_space<vmem>>, vector<1x4x4xbf16>
    %14 = vector.shape_cast %13 : vector<1x4x4xbf16> to vector<4x4xbf16>
    %cst = arith.constant dense<0.000000e+00> : vector<256x4xf32>
    %15 = tpu.matmul %5, %14, %cst {dimension_numbers = #tpu.dot_dimension_numbers<[1], [0], [0], [1], [0, 0, 1, 1], [], []>} : vector<256x4xbf16>, vector<4x4xbf16>, vector<256x4xf32> -> vector<256x4xf32>
    %c1_11 = arith.constant 1 : index
    %c0_12 = arith.constant 0 : index
    %c0_13 = arith.constant 0 : index
    %16 = vector.load %arg2[%c1_11, %c0_12, %c0_13] : memref<6x4x4xbf16, #tpu.memory_space<vmem>>, vector<1x4x4xbf16>
    %17 = vector.shape_cast %16 : vector<1x4x4xbf16> to vector<4x4xbf16>
    %cst_14 = arith.constant dense<0.000000e+00> : vector<256x4xf32>
    %18 = tpu.matmul %9, %17, %cst_14 {dimension_numbers = #tpu.dot_dimension_numbers<[1], [0], [0], [1], [0, 0, 1, 1], [], []>} : vector<256x4xbf16>, vector<4x4xbf16>, vector<256x4xf32> -> vector<256x4xf32>
    %19 = arith.addf %15, %18 : vector<256x4xf32>
    %20 = vector.broadcast %12 : vector<1x4xf32> to vector<256x4xf32>
    %21 = arith.addf %19, %20 : vector<256x4xf32>
    %22 = vector.shape_cast %21 : vector<256x4xf32> to vector<16x16x4xf32>
    %23 = arith.truncf %22 : vector<16x16x4xf32> to vector<16x16x4xbf16>
    %c0_15 = arith.constant 0 : index
    %c0_16 = arith.constant 0 : index
    %c0_17 = arith.constant 0 : index
    %c0_18 = arith.constant 0 : index
    %c0_19 = arith.constant 0 : index
    %24 = vector.load %arg4[%c0_15, %c0_16, %c0_17, %c0_18, %c0_19] : memref<1x16x2x16x4xbf16, #tpu.memory_space<vmem>>, vector<1x16x1x16x4xbf16>
    %25 = vector.shape_cast %24 : vector<1x16x1x16x4xbf16> to vector<16x16x4xbf16>
    %26 = vector.shape_cast %23 : vector<16x16x4xbf16> to vector<1x16x1x16x4xbf16>
    tpu.vector_store %arg4[%c0_15, %c0_16, %c0_17, %c0_18, %c0_19], %26 {strides = array<i32>} : memref<1x16x2x16x4xbf16, #tpu.memory_space<vmem>>, vector<1x16x1x16x4xbf16>,
    %c2 = arith.constant 2 : index
    %c0_20 = arith.constant 0 : index
    %c0_21 = arith.constant 0 : index
    %27 = vector.load %arg2[%c2, %c0_20, %c0_21] : memref<6x4x4xbf16, #tpu.memory_space<vmem>>, vector<1x4x4xbf16>
    %28 = vector.shape_cast %27 : vector<1x4x4xbf16> to vector<4x4xbf16>
    %cst_22 = arith.constant dense<0.000000e+00> : vector<256x4xf32>
    %29 = tpu.matmul %5, %28, %cst_22 {dimension_numbers = #tpu.dot_dimension_numbers<[1], [0], [0], [1], [0, 0, 1, 1], [], []>} : vector<256x4xbf16>, vector<4x4xbf16>, vector<256x4xf32> -> vector<256x4xf32>
    %c3 = arith.constant 3 : index
    %c0_23 = arith.constant 0 : index
    %c0_24 = arith.constant 0 : index
    %30 = vector.load %arg2[%c3, %c0_23, %c0_24] : memref<6x4x4xbf16, #tpu.memory_space<vmem>>, vector<1x4x4xbf16>
    %31 = vector.shape_cast %30 : vector<1x4x4xbf16> to vector<4x4xbf16>
    %cst_25 = arith.constant dense<0.000000e+00> : vector<256x4xf32>
    %32 = tpu.matmul %9, %31, %cst_25 {dimension_numbers = #tpu.dot_dimension_numbers<[1], [0], [0], [1], [0, 0, 1, 1], [], []>} : vector<256x4xbf16>, vector<4x4xbf16>, vector<256x4xf32> -> vector<256x4xf32>
    %33 = arith.addf %29, %32 : vector<256x4xf32>
    %c4 = arith.constant 4 : index
    %c0_26 = arith.constant 0 : index
    %c0_27 = arith.constant 0 : index
    %34 = vector.load %arg2[%c4, %c0_26, %c0_27] : memref<6x4x4xbf16, #tpu.memory_space<vmem>>, vector<1x4x4xbf16>
    %35 = vector.shape_cast %34 : vector<1x4x4xbf16> to vector<4x4xbf16>
    %cst_28 = arith.constant dense<0.000000e+00> : vector<256x4xf32>
    %36 = tpu.matmul %7, %35, %cst_28 {dimension_numbers = #tpu.dot_dimension_numbers<[1], [0], [0], [1], [0, 0, 1, 1], [], []>} : vector<256x4xbf16>, vector<4x4xbf16>, vector<256x4xf32> -> vector<256x4xf32>
    %37 = arith.addf %33, %36 : vector<256x4xf32>
    %c5 = arith.constant 5 : index
    %c0_29 = arith.constant 0 : index
    %c0_30 = arith.constant 0 : index
    %38 = vector.load %arg2[%c5, %c0_29, %c0_30] : memref<6x4x4xbf16, #tpu.memory_space<vmem>>, vector<1x4x4xbf16>
    %39 = vector.shape_cast %38 : vector<1x4x4xbf16> to vector<4x4xbf16>
    %cst_31 = arith.constant dense<0.000000e+00> : vector<256x4xf32>
    %40 = tpu.matmul %11, %39, %cst_31 {dimension_numbers = #tpu.dot_dimension_numbers<[1], [0], [0], [1], [0, 0, 1, 1], [], []>} : vector<256x4xbf16>, vector<4x4xbf16>, vector<256x4xf32> -> vector<256x4xf32>
    %41 = arith.addf %37, %40 : vector<256x4xf32>
    %42 = vector.broadcast %12 : vector<1x4xf32> to vector<256x4xf32>
    %43 = arith.addf %41, %42 : vector<256x4xf32>
    %44 = vector.shape_cast %43 : vector<256x4xf32> to vector<16x16x4xf32>
    %45 = arith.truncf %44 : vector<16x16x4xf32> to vector<16x16x4xbf16>
    %c0_32 = arith.constant 0 : index
    %c0_33 = arith.constant 0 : index
    %c1_34 = arith.constant 1 : index
    %c0_35 = arith.constant 0 : index
    %c0_36 = arith.constant 0 : index
    %46 = vector.load %arg4[%c0_32, %c0_33, %c1_34, %c0_35, %c0_36] : memref<1x16x2x16x4xbf16, #tpu.memory_space<vmem>>, vector<1x16x1x16x4xbf16>
    %47 = vector.shape_cast %46 : vector<1x16x1x16x4xbf16> to vector<16x16x4xbf16>
    %48 = vector.shape_cast %45 : vector<16x16x4xbf16> to vector<1x16x1x16x4xbf16>
    tpu.vector_store %arg4[%c0_32, %c0_33, %c1_34, %c0_35, %c0_36], %48 {strides = array<i32>} : memref<1x16x2x16x4xbf16, #tpu.memory_space<vmem>>, vector<1x16x1x16x4xbf16>,
    return
  }
  func.func @transform_0(%arg0: i32) -> (i32, i32, i32, i32) {
    %c0_i32 = arith.constant 0 : i32
    %c0_i32_0 = arith.constant 0 : i32
    %c0_i32_1 = arith.constant 0 : i32
    %c0_i32_2 = arith.constant 0 : i32
    return %arg0, %c0_i32, %c0_i32_0, %c0_i32_1 : i32, i32, i32, i32
  }
  func.func @transform_1(%arg0: i32) -> (i32, i32, i32) {
    %c0_i32 = arith.constant 0 : i32
    %c0_i32_0 = arith.constant 0 : i32
    %c0_i32_1 = arith.constant 0 : i32
    %c0_i32_2 = arith.constant 0 : i32
    return %c0_i32, %c0_i32_0, %c0_i32_1 : i32, i32, i32
  }
  func.func @transform_2(%arg0: i32) -> (i32, i32) {
    %c0_i32 = arith.constant 0 : i32
    %c0_i32_0 = arith.constant 0 : i32
    %c0_i32_1 = arith.constant 0 : i32
    return %c0_i32, %c0_i32_0 : i32, i32
  }
  func.func @transform_3(%arg0: i32) -> (i32, i32, i32, i32, i32) {
    %c0_i32 = arith.constant 0 : i32
    %c0_i32_0 = arith.constant 0 : i32
    %c0_i32_1 = arith.constant 0 : i32
    %c0_i32_2 = arith.constant 0 : i32
    %c0_i32_3 = arith.constant 0 : i32
    return %arg0, %c0_i32, %c0_i32_0, %c0_i32_1, %c0_i32_2 : i32, i32, i32, i32, i32
  }
}

</mosaic_0001>

<bundles_post_ra>
// kernel: up_transpose2d.1
= control target key start
LH: loop header
LB: loop body
LE: loop exit
PB: predicated region body
PF: predicated region fallthrough
CT: control target
= control target key end

     0   :  { %s3182_s12 = smov 0   ;;  %s3893_s0 = inlined_call_operand.vmem [shape: bf16[2,17,17,4], index: 0, kind: input, shape index: {}]   ;;  %s3894_s1 = inlined_call_operand.vmem [shape: bf16[6,4,4], index: 1, kind: input, shape index: {}]   ;;  %s3895_s2 = inlined_call_operand.vmem [shape: f32[1,4], index: 2, kind: input, shape index: {}]   ;;  %s3896_s3 = inlined_call_operand.vmem [shape: bf16[2,16,2,16,4], index: 3, kind: output, shape index: {}]  }
   0x1 LB: > { %s2381_s13 = sadd.s32 4294967295, %s3160_s12   ;;  %p2385_p0 = scmp.ge.s32.totalorder %s3160_s12, 1  ;;  %s3160_s12 = sphi %s3182_s12, %s13_s12  }
   0x2   : > { %p137_p1 = scmp.lt.s32.totalorder %s3160_s12, 3 }
   0x4   : > { %p138_p2 = pnand %p2385_p0, %p137_p1 }
   0x5   : > { %vm735_vm0 = vcmask (!%p138_p2), 1041408   ;;  %v2487_v0 = vld [vmem:[%s3894_s1 + $0x4] sm:$0x3] (!%p138_p2)  ;;  %p161_p3 = scmp.lt.s32.totalorder (!%p138_p2), %s2381_s13, 1  ;;  %v2389_v2 = vld [vmem:[%s3894_s1 + $0x2] sm:$0x3] (!%p138_p2) }
   0x6   : > { %141 = sbr.rel (%p138_p2) target bundleno = 448 (0x1c0), region = 32  ;;  %3125 = vmatprep.subr.msk.bf16.mxu1 (!%p138_p2), %vm735_vm0, %v2487_v0  ;;  %v1560_v1 = vsel (!%p138_p2), %vm735_vm0, %v2487_v0, 0  ;;  %3122 = vmatprep.subr.msk.bf16.mxu0 (!%p138_p2), %vm735_vm0, %v2389_v2  ;;  %v737_v3 = vsel (!%p138_p2), %vm735_vm0, %v2389_v2, 0  ;;  %v635_v4 = vld [vmem:[%s3894_s1] sm:$0x3] (!%p138_p2)  ;;  %vm686_vm1 = vcmask (!%p138_p2), 31744  }
   0x7   : > { %2893 = vmatpush3.bf16.msra.mxu1 (!%p138_p2), %v1560_v1  ;;  %2791 = vmatpush3.bf16.msra.mxu0 (!%p138_p2), %v737_v3  ;;  %v2521_v5 = vld [vmem:[%s3894_s1 + $0x8] sm:$0x3] (!%p138_p2)  ;;  %v3211_v6 = vld [vmem:[%s3894_s1 + $0x6] sm:$0x3] (!%p138_p2)  ;;  %v2539_v7 = vld [vmem:[%s3894_s1 + $0xa] sm:$0x3] (!%p138_p2) }
   0x8   : > { %3123 = vmatprep.subr.msk.bf16.mxu0 (!%p138_p2), %vm735_vm0, %v635_v4  ;;  %3126 = vmatprep.subr.msk.bf16.mxu1 (!%p138_p2), %vm735_vm0, %v2521_v5  ;;  %v3221_v8 = vsel (!%p138_p2), %vm735_vm0, %v3211_v6, 0  ;;  %v3224_v9 = vsel (!%p138_p2), %vm735_vm0, %v2539_v7, 0  ;;  %vm223_vm2 = vsmask.f32 (!%p138_p2), 3328  ;;  %vm224_vm3 = vsmask.f32 (!%p138_p2), 7440 }
   0x9   : > { %v3232_v10 = vsel (!%p138_p2), %vm735_vm0, %v635_v4, 0  ;;  %v1734_v11 = vsel (!%p138_p2), %vm735_vm0, %v2521_v5, 0  ;;  %vm3260_vm4 = vmor (!%p138_p2), %vm223_vm2, %vm224_vm3  ;;  %v3690_v48 = vld [vmem:[%s3895_s2] ss:$0 sm:$0xff] (!%p138_p2)  ;;  %vm1358_vm5 = vcmask (!%p138_p2), 27648  }
   0xd   : > { %s3900_s13 = smov (!%p161_p3, %s2381_s13), 1 }
   0xe   : > { %s3128_s24 = smul.u32 204, %s3900_s13  ;;  %s2623_s5 = sshll.u32 %s3900_s13, 8 }
   0xf   : > { %s3697_s8 = scalar_lea.vmem %s3896_s3, %s2623_s5 }
  0x10   : > { %s3229_s29 = scalar_lea.vmem %s3893_s0, %s3128_s24 }
  0x11   : > { %v172_v12 = vld [vmem:[%s3229_s29] sm:$0xf]  ;;  %v173_v13 = vld [vmem:[%s3229_s29 + $0x4] sm:$0xf]  ;;  %v174_v14 = vld [vmem:[%s3229_s29 + $0xc] sm:$0xf] }
  0x12   : > { %v227_v15 = vshrl.u32 %v172_v12, 16  ;;  %v230_v16 = vshll.u32 %v172_v12, 16  ;;  %v236_v17 = vshll.u32 %v173_v13, 16  ;;  %v240_v18 = vshrl.u32 %v173_v13, 16  ;;  %v175_v19 = vld [vmem:[%s3229_s29 + $0x10] sm:$0xf] }
  0x13   : > { %v3239_v20 = vcombine.low %v172_v12, %v173_v13  ;;  %v251_v21 = vshrl.u32 %v174_v14, 16  ;;  %v254_v22 = vshll.u32 %v174_v14, 16  ;;  %v260_v23 = vshll.u32 %v175_v19, 16  ;;  %v176_v24 = vld [vmem:[%s3229_s29 + $0x18] sm:$0xf] }
  0x14   : > { %v229_v25 = vrot.slane %v227_v15, 4  ;;  %v232_v26 = vrot.slane %v230_v16, 5  ;;  %v238_v27 = vrot.slane %v236_v17, 5  ;;  %v242_v28 = vrot.slane %v240_v18, 4  ;;  %v177_v29 = vld [vmem:[%s3229_s29 + $0x1c] sm:$0xf] }
  0x15   : > { %2894 = vmatprep.mubr.msk.bf16.mxu1 %vm686_vm1, %v3239_v20  ;;  %v253_v30 = vrot.slane %v251_v21, 4  ;;  %v256_v31 = vrot.slane %v254_v22, 5  ;;  %v3245_v32 = vrot.slane %v260_v23, 5  ;;  %v264_v33 = vshrl.u32 %v175_v19, 16  ;;  %v206_v34 = vld [vmem:[%s3229_s29 + $0x8] sm:$0x1] }
  0x16   : > { %v3248_v35 = vcombine.low %v174_v14, %v175_v19  ;;  %v275_v36 = vshrl.u32 %v176_v24, 16  ;;  %v278_v37 = vshll.u32 %v176_v24, 16  ;;  %v284_v38 = vshll.u32 %v177_v29, 16  ;;  %v178_v39 = vld [vmem:[%s3229_s29 + $0x24] sm:$0xf] }
  0x17   : > { %v266_v40 = vrot.slane %v264_v33, 4  ;;  %v288_v41 = vshrl.u32 %v177_v29, 16  ;;  %v3251_v42 = vcombine.low %v176_v24, %v177_v29  ;;  %v233_v43 = vor.u32 %v232_v26, %v229_v25  ;;  %v179_v44 = vld [vmem:[%s3229_s29 + $0x28] sm:$0xf]  ;;  %v207_v54 = vld [vmem:[%s3229_s29 + $0x14] sm:$0x1] }
  0x18   : > { %2895 = vmatmul.mubr.msk.bf16.vlgmr.msra.gmra.mrb[0].mxu1 %vm686_vm1, %v3248_v35  ;;  %v277_v45 = vrot.slane %v275_v36, 4  ;;  %v280_v46 = vrot.slane %v278_v37, 5  ;;  %v3256_v47 = vrot.slane %v284_v38, 5  ;;  %v243_v49 = vor.u32 %v242_v28, %v238_v27  ;;  %v180_v59 = vld [vmem:[%s3229_s29 + $0x30] sm:$0xf] }
  0x19   : > { %v290_v50 = vrot.slane %v288_v41, 4  ;;  %2898 = vmatprep.mubr.msk.bf16.mxu1 %vm686_vm1, %v3251_v42  ;;  %v234_v51 = vrot.slane %v233_v43, 4  ;;  %v246_v52 = vshll.u32 %v206_v34, 16  ;;  %v299_v53 = vshrl.u32 %v178_v39, 16  ;;  %2927 = vmatpush3.bf16.msra.mxu1 %v1734_v11  ;;  %v181_v0 = vld [vmem:[%s3229_s29 + $0x34] sm:$0xf] }
  0x1a   : > { %v244_v55 = vrot.slane %v243_v49, 4  ;;  %v302_v56 = vshll.u32 %v178_v39, 16  ;;  %v308_v57 = vshll.u32 %v179_v44, 16  ;;  %v312_v58 = vshrl.u32 %v179_v44, 16  ;;  %3127 = vmatprep.subr.msk.bf16.mxu1 %vm735_vm0, %v2539_v7  ;;  %v208_v17 = vld [vmem:[%s3229_s29 + $0x20] sm:$0x1] }
  0x1b   : > { %v239_v60 = vsel %vm3260_vm4, %v234_v51, %v238_v27  ;;  %v248_v61 = vrot.slane %v246_v52, 5  ;;  %v301_v62 = vrot.slane %v299_v53, 4  ;;  %v3271_v63 = vcombine.low %v178_v39, %v179_v44  ;;  %v182_v23 = vld [vmem:[%s3229_s29 + $0x3c] sm:$0xf]  ;;  %v183_v28 = vld [vmem:[%s3229_s29 + $0x40] sm:$0xf] }
  0x1c   : > { %v304_v1 = vrot.slane %v302_v56, 5  ;;  %v3274_v2 = vrot.slane %v308_v57, 5  ;;  %v314_v3 = vrot.slane %v312_v58, 4  ;;  %v257_v4 = vor.u32 %v256_v31, %v253_v30  ;;  %v209_v38 = vld [vmem:[%s3229_s29 + $0x2c] sm:$0x1] }
  0x1d   : > { %v249_v5 = vsel %vm3260_vm4, %v244_v55, %v248_v61  ;;  %v267_v7 = vor.u32 %v266_v40, %v3245_v32  ;;  %v270_v11 = vshll.u32 %v207_v54, 16  ;;  %v323_v12 = vshrl.u32 %v180_v59, 16  ;;  %v184_v44 = vld [vmem:[%s3229_s29 + $0x48] sm:$0xf]  ;;  %v185_v51 = vld [vmem:[%s3229_s29 + $0x4c] sm:$0xf] }
  0x1e   : > { %v3279_v13 = vcombine.low %v239_v60, %v249_v5  ;;  %v258_v14 = vrot.slane %v257_v4, 4  ;;  %v326_v15 = vshll.u32 %v180_v59, 16  ;;  %v332_v16 = vshll.u32 %v181_v0, 16  ;;  %v186_v5 = vld [vmem:[%s3229_s29 + $0x54] sm:$0xf] }
  0x1f   : > { %v268_v18 = vrot.slane %v267_v7, 4  ;;  %v272_v19 = vrot.slane %v270_v11, 5  ;;  %v3282_v21 = vrot.slane %v323_v12, 4  ;;  %v336_v22 = vshrl.u32 %v181_v0, 16 }
  0x20   : > { %2792 = vmatprep.mubr.msk.bf16.mxu0 %vm686_vm1, %v3279_v13  ;;  %2899 = vmatmul.mubr.msk.bf16.gmra.mrb[4].mxu1 %vm686_vm1, %v3271_v63  ;;  %v263_v24 = vsel %vm3260_vm4, %v258_v14, %v3245_v32  ;;  %v328_v25 = vrot.slane %v326_v15, 5  ;;  %v3292_v26 = vrot.slane %v332_v16, 5  ;;  %v3294_v27 = vcombine.low %v180_v59, %v181_v0  ;;  %v210_v0 = vld [vmem:[%s3229_s29 + $0x38] sm:$0x1] }
  0x21   : > { %v273_v29 = vsel %vm3260_vm4, %v268_v18, %v272_v19  ;;  %v338_v30 = vrot.slane %v336_v22, 4  ;;  %v281_v31 = vor.u32 %v280_v46, %v277_v45  ;;  %v291_v33 = vor.u32 %v290_v50, %v3256_v47  ;;  %v187_v14 = vld [vmem:[%s3229_s29 + $0x58] sm:$0xf] }
  0x22   : > { %v3300_v34 = vcombine.low %v263_v24, %v273_v29  ;;  %2902 = vmatprep.mubr.msk.bf16.mxu1 %vm686_vm1, %v3294_v27  ;;  %v294_v32 = vshll.u32 %v208_v17, 16  ;;  %v347_v36 = vshrl.u32 %v182_v23, 16  ;;  %v350_v37 = vshll.u32 %v182_v23, 16  ;;  %v211_v24 = vld [vmem:[%s3229_s29 + $0x44] sm:$0x1] }
  0x23   : > { %v282_v39 = vrot.slane %v281_v31, 4  ;;  %v292_v40 = vrot.slane %v291_v33, 4  ;;  %v356_v41 = vshll.u32 %v183_v28, 16  ;;  %v360_v43 = vshrl.u32 %v183_v28, 16 }
  0x24   : > { %2793 = vmatmul.mubr.msk.bf16.vlgmr.msra.gmra.mrb[0].mxu0 %vm686_vm1, %v3300_v34  ;;  %v296_v45 = vrot.slane %v294_v32, 5  ;;  %v349_v46 = vrot.slane %v347_v36, 4  ;;  %v352_v49 = vrot.slane %v350_v37, 5  ;;  %v3308_v50 = vcombine.low %v182_v23, %v183_v28  ;;  %v188_v32 = vld [vmem:[%s3229_s29 + $0x60] sm:$0xf] }
  0x25   : > { %2825 = vmatpush3.bf16.msra.mxu0 %v3232_v10  ;;  %v287_v52 = vsel %vm3260_vm4, %v282_v39, %v3256_v47  ;;  %v3315_v53 = vrot.slane %v356_v41, 5  ;;  %v362_v54 = vrot.slane %v360_v43, 4  ;;  %v305_v55 = vor.u32 %v304_v1, %v301_v62  ;;  %v189_v37 = vld [vmem:[%s3229_s29 + $0x64] sm:$0xf] }
  0x26   : > { %v297_v56 = vsel %vm3260_vm4, %v292_v40, %v296_v45  ;;  %v315_v57 = vor.u32 %v314_v3, %v3274_v2  ;;  %v318_v58 = vshll.u32 %v209_v38, 16  ;;  %v371_v59 = vshrl.u32 %v184_v44, 16  ;;  %3124 = vmatprep.subr.msk.bf16.mxu0 %vm735_vm0, %v3211_v6 }
  0x27   : > { %v3322_v10 = vcombine.low %v287_v52, %v297_v56  ;;  %v306_v60 = vrot.slane %v305_v55, 4  ;;  %v374_v47 = vshll.u32 %v184_v44, 16  ;;  %v380_v61 = vshll.u32 %v185_v51, 16 }
  0x28   : > { %2903 = vmatmul.mubr.msk.bf16.gmra.mrb[8].mxu1 %vm686_vm1, %v3308_v50  ;;  %v316_v62 = vrot.slane %v315_v57, 4  ;;  %v320_v1 = vrot.slane %v318_v58, 5  ;;  %v3327_v4 = vrot.slane %v371_v59, 4  ;;  %v384_v3 = vshrl.u32 %v185_v51, 16  ;;  %v212_v57 = vld [vmem:[%s3229_s29 + $0x50] sm:$0x1] }
  0x29   : > { %2796 = vmatprep.mubr.msk.bf16.mxu0 %vm686_vm1, %v3322_v10  ;;  %v311_v6 = vsel %vm3260_vm4, %v306_v60, %v3274_v2  ;;  %v376_v7 = vrot.slane %v374_v47, 5  ;;  %v3335_v11 = vrot.slane %v380_v61, 5  ;;  %v3337_v12 = vcombine.low %v184_v44, %v185_v51  ;;  %v190_v60 = vld [vmem:[%s3229_s29 + $0x6c] sm:$0xf] }
  0x2a   : > { %v321_v15 = vsel %vm3260_vm4, %v316_v62, %v320_v1  ;;  %v386_v16 = vrot.slane %v384_v3, 4  ;;  %v329_v17 = vor.u32 %v328_v25, %v3282_v21  ;;  %v339_v18 = vor.u32 %v338_v30, %v3292_v26  ;;  %v191_v62 = vld [vmem:[%s3229_s29 + $0x70] sm:$0xf] }
  0x2b   : > { %v3344_v19 = vcombine.low %v311_v6, %v321_v15  ;;  %2906 = vmatprep.mubr.msk.bf16.mxu1 %vm686_vm1, %v3337_v12  ;;  %v342_v2 = vshll.u32 %v210_v0, 16  ;;  %v395_v22 = vshrl.u32 %v186_v5, 16  ;;  %v398_v23 = vshll.u32 %v186_v5, 16 }
  0x2c   : > { %v330_v28 = vrot.slane %v329_v17, 4  ;;  %v340_v29 = vrot.slane %v339_v18, 4  ;;  %v404_v31 = vshll.u32 %v187_v14, 16  ;;  %v408_v33 = vshrl.u32 %v187_v14, 16  ;;  %v213_v18 = vld [vmem:[%s3229_s29 + $0x5c] sm:$0x1] }
  0x2d   : > { %2797 = vmatmul.mubr.msk.bf16.gmra.mrb[4].mxu0 %vm686_vm1, %v3344_v19  ;;  %v344_v21 = vrot.slane %v342_v2, 5  ;;  %v397_v25 = vrot.slane %v395_v22, 4  ;;  %v400_v30 = vrot.slane %v398_v23, 5  ;;  %v3352_v36 = vcombine.low %v186_v5, %v187_v14 }
  0x2e   : > { %v335_v38 = vsel %vm3260_vm4, %v330_v28, %v3292_v26  ;;  %v3358_v39 = vrot.slane %v404_v31, 5  ;;  %v410_v40 = vrot.slane %v408_v33, 4  ;;  %v353_v41 = vor.u32 %v352_v49, %v349_v46  ;;  %v192_v28 = vld [vmem:[%s3229_s29 + $0x78] sm:$0xf]  ;;  %v193_v31 = vld [vmem:[%s3229_s29 + $0x7c] sm:$0xf] }
  0x2f   : > { %v345_v43 = vsel %vm3260_vm4, %v340_v29, %v344_v21  ;;  %v363_v44 = vor.u32 %v362_v54, %v3315_v53  ;;  %v366_v45 = vshll.u32 %v211_v24, 16  ;;  %v419_v51 = vshrl.u32 %v188_v32, 16 }
  0x30   : > { %v3363_v52 = vcombine.low %v335_v38, %v345_v43  ;;  %2907 = vmatmul.mubr.msk.bf16.gmra.mrb[12].mxu1 %vm686_vm1, %v3352_v36  ;;  %v354_v55 = vrot.slane %v353_v41, 4  ;;  %v422_v26 = vshll.u32 %v188_v32, 16  ;;  %v428_v56 = vshll.u32 %v189_v37, 16 }
  0x31   : > { %v364_v58 = vrot.slane %v363_v44, 4  ;;  %v368_v59 = vrot.slane %v366_v45, 5  ;;  %v3368_v46 = vrot.slane %v419_v51, 4  ;;  %v432_v49 = vshrl.u32 %v189_v37, 16 }
  0x32   : > { %2800 = vmatprep.mubr.msk.bf16.mxu0 %vm686_vm1, %v3363_v52  ;;  %v359_v54 = vsel %vm3260_vm4, %v354_v55, %v3315_v53  ;;  %v424_v47 = vrot.slane %v422_v26, 5  ;;  %v3376_v61 = vrot.slane %v428_v56, 5  ;;  %v3378_v0 = vcombine.low %v188_v32, %v189_v37  ;;  %v214_v26 = vld [vmem:[%s3229_s29 + $0x68] sm:$0x1] }
  0x33   : > { %v369_v1 = vsel %vm3260_vm4, %v364_v58, %v368_v59  ;;  %v434_v3 = vrot.slane %v432_v49, 4  ;;  %v377_v5 = vor.u32 %v376_v7, %v3327_v4  ;;  %v387_v6 = vor.u32 %v386_v16, %v3335_v11  ;;  %v194_v58 = vld [vmem:[%s3229_s29 + $0x84] sm:$0xf] }
  0x34   : > { %v3385_v14 = vcombine.low %v359_v54, %v369_v1  ;;  %2910 = vmatprep.mubr.msk.bf16.mxu1 %vm686_vm1, %v3378_v0  ;;  %v390_v53 = vshll.u32 %v212_v57, 16  ;;  %v443_v15 = vshrl.u32 %v190_v60, 16  ;;  %v446_v17 = vshll.u32 %v190_v60, 16  ;;  %v195_v54 = vld [vmem:[%s3229_s29 + $0x88] sm:$0xf] }
  0x35   : > { %v378_v2 = vrot.slane %v377_v5, 4  ;;  %v388_v22 = vrot.slane %v387_v6, 4  ;;  %v452_v23 = vshll.u32 %v191_v62, 16  ;;  %v456_v24 = vshrl.u32 %v191_v62, 16 }
  0x36   : > { %2801 = vmatmul.mubr.msk.bf16.gmra.mrb[8].mxu0 %vm686_vm1, %v3385_v14  ;;  %v392_v4 = vrot.slane %v390_v53, 5  ;;  %v445_v7 = vrot.slane %v443_v15, 4  ;;  %v448_v16 = vrot.slane %v446_v17, 5  ;;  %v3393_v29 = vcombine.low %v190_v60, %v191_v62 }
  0x37   : > { %v383_v33 = vsel %vm3260_vm4, %v378_v2, %v3335_v11  ;;  %v3399_v32 = vrot.slane %v452_v23, 5  ;;  %v458_v21 = vrot.slane %v456_v24, 4  ;;  %v401_v37 = vor.u32 %v400_v30, %v397_v25 }
  0x38   : > { %v393_v38 = vsel %vm3260_vm4, %v388_v22, %v392_v4  ;;  %2911 = vmatmul.mubr.msk.bf16.gmra.mrb[16].mxu1 %vm686_vm1, %v3393_v29  ;;  %v411_v41 = vor.u32 %v410_v40, %v3358_v39  ;;  %v414_v43 = vshll.u32 %v213_v18, 16  ;;  %v467_v44 = vshrl.u32 %v192_v28, 16  ;;  %v215_v18 = vld [vmem:[%s3229_s29 + $0x74] sm:$0x1] }
  0x39   : > { %v3406_v45 = vcombine.low %v383_v33, %v393_v38  ;;  %v402_v51 = vrot.slane %v401_v37, 4  ;;  %v470_v11 = vshll.u32 %v192_v28, 16  ;;  %v476_v55 = vshll.u32 %v193_v31, 16 }
  0x3a   : > { %v412_v56 = vrot.slane %v411_v41, 4  ;;  %v416_v57 = vrot.slane %v414_v43, 5  ;;  %v3409_v25 = vrot.slane %v467_v44, 4  ;;  %v480_v30 = vshrl.u32 %v193_v31, 16 }
  0x3b   : > { %2804 = vmatprep.mubr.msk.bf16.mxu0 %vm686_vm1, %v3406_v45  ;;  %v407_v40 = vsel %vm3260_vm4, %v402_v51, %v3358_v39  ;;  %v472_v59 = vrot.slane %v470_v11, 5  ;;  %v3417_v49 = vrot.slane %v476_v55, 5  ;;  %v3419_v60 = vcombine.low %v192_v28, %v193_v31  ;;  %v196_v28 = vld [vmem:[%s3229_s29 + $0x90] sm:$0xf]  ;;  %v197_v31 = vld [vmem:[%s3229_s29 + $0x94] sm:$0xf] }
  0x3c   : > { %v417_v62 = vsel %vm3260_vm4, %v412_v56, %v416_v57  ;;  %v482_v1 = vrot.slane %v480_v30, 4  ;;  %v425_v5 = vor.u32 %v424_v47, %v3368_v46  ;;  %v435_v6 = vor.u32 %v434_v3, %v3376_v61  ;;  %v216_v57 = vld [vmem:[%s3229_s29 + $0x80] sm:$0x1] }
  0x3d   : > { %v3426_v53 = vcombine.low %v407_v40, %v417_v62  ;;  %2914 = vmatprep.mubr.msk.bf16.mxu1 %vm686_vm1, %v3419_v60  ;;  %v438_v39 = vshll.u32 %v214_v26, 16  ;;  %v491_v15 = vshrl.u32 %v194_v58, 16  ;;  %v494_v17 = vshll.u32 %v194_v58, 16  ;;  %v198_v40 = vld [vmem:[%s3229_s29 + $0x9c] sm:$0xf] }
  0x3e   : > { %v426_v2 = vrot.slane %v425_v5, 4  ;;  %v436_v22 = vrot.slane %v435_v6, 4  ;;  %v500_v23 = vshll.u32 %v195_v54, 16  ;;  %v504_v24 = vshrl.u32 %v195_v54, 16  ;;  %v199_v6 = vld [vmem:[%s3229_s29 + $0xa0] sm:$0xf] }
  0x3f   : > { %2805 = vmatmul.mubr.msk.bf16.gmra.mrb[12].mxu0 %vm686_vm1, %v3426_v53  ;;  %v440_v46 = vrot.slane %v438_v39, 5  ;;  %v493_v47 = vrot.slane %v491_v15, 4  ;;  %v496_v3 = vrot.slane %v494_v17, 5  ;;  %v3434_v4 = vcombine.low %v194_v58, %v195_v54 }
  0x40   : > { %v431_v33 = vsel %vm3260_vm4, %v426_v2, %v3376_v61  ;;  %v3440_v37 = vrot.slane %v500_v23, 5  ;;  %v506_v38 = vrot.slane %v504_v24, 4  ;;  %v449_v41 = vor.u32 %v448_v16, %v445_v7  ;;  %v217_v24 = vld [vmem:[%s3229_s29 + $0x8c] sm:$0x1] }
  0x41   : > { %v441_v43 = vsel %vm3260_vm4, %v436_v22, %v440_v46  ;;  %2915 = vmatmul.mubr.msk.bf16.gmra.mrb[20].mxu1 %vm686_vm1, %v3434_v4  ;;  %v459_v44 = vor.u32 %v458_v21, %v3399_v32  ;;  %v462_v51 = vshll.u32 %v215_v18, 16  ;;  %v515_v11 = vshrl.u32 %v196_v28, 16 }
  0x42   : > { %v3447_v55 = vcombine.low %v431_v33, %v441_v43  ;;  %v450_v26 = vrot.slane %v449_v41, 4  ;;  %v518_v61 = vshll.u32 %v196_v28, 16  ;;  %v524_v56 = vshll.u32 %v197_v31, 16  ;;  %v200_v41 = vld [vmem:[%s3229_s29 + $0xa8] sm:$0xf] }
  0x43   : > { %v460_v30 = vrot.slane %v459_v44, 4  ;;  %v464_v58 = vrot.slane %v462_v51, 5  ;;  %v3450_v7 = vrot.slane %v515_v11, 4  ;;  %v528_v16 = vshrl.u32 %v197_v31, 16  ;;  %v201_v44 = vld [vmem:[%s3229_s29 + $0xac] sm:$0xf] }
  0x44   : > { %2808 = vmatprep.mubr.msk.bf16.mxu0 %vm686_vm1, %v3447_v55  ;;  %v455_v21 = vsel %vm3260_vm4, %v450_v26, %v3399_v32  ;;  %v520_v54 = vrot.slane %v518_v61, 5  ;;  %v3458_v62 = vrot.slane %v524_v56, 5  ;;  %v3460_v5 = vcombine.low %v196_v28, %v197_v31 }
  0x45   : > { %v465_v39 = vsel %vm3260_vm4, %v460_v30, %v464_v58  ;;  %v530_v15 = vrot.slane %v528_v16, 4  ;;  %v473_v17 = vor.u32 %v472_v59, %v3409_v25  ;;  %v483_v18 = vor.u32 %v482_v1, %v3417_v49 }
  0x46   : > { %v3467_v2 = vcombine.low %v455_v21, %v465_v39  ;;  %2918 = vmatprep.mubr.msk.bf16.mxu1 %vm686_vm1, %v3460_v5  ;;  %v486_v32 = vshll.u32 %v216_v57, 16  ;;  %v539_v22 = vshrl.u32 %v198_v40, 16  ;;  %v542_v23 = vshll.u32 %v198_v40, 16 }
  0x47   : > { %v474_v28 = vrot.slane %v473_v17, 4  ;;  %v484_v46 = vrot.slane %v483_v18, 4  ;;  %v548_v31 = vshll.u32 %v199_v6, 16  ;;  %v552_v33 = vshrl.u32 %v199_v6, 16  ;;  %v202_v18 = vld [vmem:[%s3229_s29 + $0xb4] sm:$0xf] }
  0x48   : > { %2809 = vmatmul.mubr.msk.bf16.gmra.mrb[16].mxu0 %vm686_vm1, %v3467_v2  ;;  %v488_v25 = vrot.slane %v486_v32, 5  ;;  %v541_v59 = vrot.slane %v539_v22, 4  ;;  %v544_v1 = vrot.slane %v542_v23, 5  ;;  %v3475_v43 = vcombine.low %v198_v40, %v199_v6  ;;  %v218_v6 = vld [vmem:[%s3229_s29 + $0x98] sm:$0x1] }
  0x49   : > { %v479_v51 = vsel %vm3260_vm4, %v474_v28, %v3417_v49  ;;  %v3481_v11 = vrot.slane %v548_v31, 5  ;;  %v554_v26 = vrot.slane %v552_v33, 4  ;;  %v497_v61 = vor.u32 %v496_v3, %v493_v47 }
  0x4a   : > { %v489_v56 = vsel %vm3260_vm4, %v484_v46, %v488_v25  ;;  %2919 = vmatmul.mubr.msk.bf16.gmra.mrb[24].mxu1 %vm686_vm1, %v3475_v43  ;;  %v507_v57 = vor.u32 %v506_v38, %v3440_v37  ;;  %v510_v30 = vshll.u32 %v217_v24, 16  ;;  %v563_v58 = vshrl.u32 %v200_v41, 16  ;;  %v203_v24 = vld [vmem:[%s3229_s29 + $0xb8] sm:$0xf] }
  0x4b   : > { %v3488_v16 = vcombine.low %v479_v51, %v489_v56  ;;  %v498_v40 = vrot.slane %v497_v61, 4  ;;  %v566_v49 = vshll.u32 %v200_v41, 16  ;;  %v572_v21 = vshll.u32 %v201_v44, 16 }
  0x4c   : > { %v508_v39 = vrot.slane %v507_v57, 4  ;;  %v512_v17 = vrot.slane %v510_v30, 5  ;;  %v565_v47 = vrot.slane %v563_v58, 4  ;;  %v576_v3 = vshrl.u32 %v201_v44, 16  ;;  %v219_v30 = vld [vmem:[%s3229_s29 + $0xa4] sm:$0x1] }
  0x4d   : > { %2812 = vmatprep.mubr.msk.bf16.mxu0 %vm686_vm1, %v3488_v16  ;;  %v503_v38 = vsel %vm3260_vm4, %v498_v40, %v3440_v37  ;;  %v568_v32 = vrot.slane %v566_v49, 5  ;;  %v574_v22 = vrot.slane %v572_v21, 5  ;;  %v3497_v23 = vcombine.low %v200_v41, %v201_v44  ;;  %v220_v40 = vld [vmem:[%s3229_s29 + $0xb0] sm:$0x1] }
  0x4e   : > { %v513_v28 = vsel %vm3260_vm4, %v508_v39, %v512_v17  ;;  %v578_v46 = vrot.slane %v576_v3, 4  ;;  %v521_v31 = vor.u32 %v520_v54, %v3450_v7  ;;  %v531_v33 = vor.u32 %v530_v15, %v3458_v62 }
  0x4f   : > { %v3504_v25 = vcombine.low %v503_v38, %v513_v28  ;;  %2922 = vmatprep.mubr.msk.bf16.mxu1 %vm686_vm1, %v3497_v23  ;;  %v534_v37 = vshll.u32 %v218_v6, 16  ;;  %v587_v51 = vshrl.u32 %v202_v18, 16  ;;  %v590_v61 = vshll.u32 %v202_v18, 16 }
  0x50   : > { %v522_v41 = vrot.slane %v521_v31, 4  ;;  %v532_v44 = vrot.slane %v531_v33, 4  ;;  %v596_v56 = vshll.u32 %v203_v24, 16  ;;  %v600_v57 = vshrl.u32 %v203_v24, 16  ;;  %v221_v33 = vld [vmem:[%s3229_s29 + $0xbc] sm:$0x1] }
  0x51   : > { %2813 = vmatmul.mubr.msk.bf16.gmra.mrb[20].mxu0 %vm686_vm1, %v3504_v25  ;;  %v536_v7 = vrot.slane %v534_v37, 5  ;;  %v589_v54 = vrot.slane %v587_v51, 4  ;;  %v592_v15 = vrot.slane %v590_v61, 5  ;;  %v3511_v58 = vcombine.low %v202_v18, %v203_v24 }
  0x52   : > { %v527_v49 = vsel %vm3260_vm4, %v522_v41, %v3458_v62  ;;  %v598_v21 = vrot.slane %v596_v56, 5  ;;  %v602_v6 = vrot.slane %v600_v57, 4  ;;  %v545_v39 = vor.u32 %v544_v1, %v541_v59 }
  0x53   : > { %v537_v17 = vsel %vm3260_vm4, %v532_v44, %v536_v7  ;;  %2923 = vmatmul.mubr.msk.bf16.gmra.mrb[28].mxu1 %vm686_vm1, %v3511_v58  ;;  %v555_v3 = vor.u32 %v554_v26, %v3481_v11  ;;  %v558_v38 = vshll.u32 %v219_v30, 16  ;;  %v569_v18 = vor.u32 %v568_v32, %v565_v47 }
  0x54   : > { %v3522_v24 = vcombine.low %v527_v49, %v537_v17  ;;  %v546_v28 = vrot.slane %v545_v39, 4  ;;  %2928 = vmatprep.mubr.msk.bf16.mxu1 %vm686_vm1, %v3248_v35  ;;  %v579_v62 = vor.u32 %v578_v46, %v574_v22  ;;  %v582_v31 = vshll.u32 %v220_v40, 16 }
  0x55   : > { %v556_v59 = vrot.slane %v555_v3, 4  ;;  %v560_v1 = vrot.slane %v558_v38, 5  ;;  %v570_v37 = vrot.slane %v569_v18, 4  ;;  %v593_v51 = vor.u32 %v592_v15, %v589_v54 }
  0x56   : > { %2816 = vmatprep.mubr.msk.bf16.mxu0 %vm686_vm1, %v3522_v24  ;;  %v551_v26 = vsel %vm3260_vm4, %v546_v28, %v3481_v11  ;;  %v580_v47 = vrot.slane %v579_v62, 4  ;;  %v584_v32 = vrot.slane %v582_v31, 5  ;;  %v603_v61 = vor.u32 %v602_v6, %v598_v21 }
  0x57   : > { %v561_v41 = vsel %vm3260_vm4, %v556_v59, %v560_v1  ;;  %v575_v46 = vsel %vm3260_vm4, %v570_v37, %v574_v22  ;;  %v594_v44 = vrot.slane %v593_v51, 4  ;;  %v606_v56 = vshll.u32 %v221_v33, 16 }
  0x58   : > { %v3536_v57 = vcombine.low %v551_v26, %v561_v41  ;;  %v585_v30 = vsel %vm3260_vm4, %v580_v47, %v584_v32  ;;  %v604_v7 = vrot.slane %v603_v61, 4 }
  0x59   : > { %v3540_v54 = vcombine.low %v575_v46, %v585_v30  ;;  %v608_v11 = vrot.slane %v606_v56, 5  ;;  %v599_v22 = vsel %vm3260_vm4, %v594_v44, %v598_v21 }
  0x5a   : > { %2817 = vmatmul.mubr.msk.bf16.gmra.mrb[24].mxu0 %vm686_vm1, %v3536_v57 }
  0x5b   : > { %2820 = vmatprep.mubr.msk.bf16.mxu0 %vm686_vm1, %v3540_v54  ;;  %2929 = vmatmul.mubr.msk.bf16.vlgmr.msra.gmra.mrb[0].mxu1 %vm686_vm1, %v3251_v42  ;;  %v609_v15 = vsel %vm3260_vm4, %v604_v7, %v608_v11 }
  0x5c   : > { %2932 = vmatprep.mubr.msk.bf16.mxu1 %vm686_vm1, %v3271_v63  ;;  %2961 = vmatpush3.bf16.msra.mxu1 %v3224_v9  ;;  %v3555_v40 = vcombine.low %v599_v22, %v609_v15  ;;  %v205_v9 = vld [vmem:[%s3229_s29 + $0xc4] sm:$0xf] }
  0x62   : > { %2821 = vmatmul.mubr.msk.bf16.gmra.mrb[28].mxu0 %vm686_vm1, %v3555_v40 }
  0x63   : > { %2826 = vmatprep.mubr.msk.bf16.mxu0 %vm686_vm1, %v3239_v20  ;;  %2933 = vmatmul.mubr.msk.bf16.gmra.mrb[4].mxu1 %vm686_vm1, %v3294_v27 }
  0x64   : > { %2936 = vmatprep.mubr.msk.bf16.mxu1 %vm686_vm1, %v3308_v50 }
  0x6a   : > { %2827 = vmatmul.mubr.msk.bf16.vlgmr.msra.gmra.mrb[0].mxu0 %vm686_vm1, %v3248_v35 }
  0x6b   : > { %2859 = vmatpush3.bf16.msra.mxu0 %v3221_v8  ;;  %2830 = vmatprep.mubr.msk.bf16.mxu0 %vm686_vm1, %v3251_v42  ;;  %v204_v8 = vld [vmem:[%s3229_s29 + $0xc0] sm:$0xf] }
  0x6c   : > { %2937 = vmatmul.mubr.msk.bf16.gmra.mrb[8].mxu1 %vm686_vm1, %v3337_v12  ;;  %v2522_v20 = vcombine.low %v204_v8, %v205_v9  ;;  %v611_v35 = vshrl.u32 %v204_v8, 16  ;;  %v614_v42 = vshll.u32 %v204_v8, 16 }
  0x6d   : > { %2940 = vmatprep.mubr.msk.bf16.mxu1 %vm686_vm1, %v3352_v36 }
  0x72   : > { %2831 = vmatmul.mubr.msk.bf16.gmra.mrb[4].mxu0 %vm686_vm1, %v3271_v63  ;;  %v620_v63 = vshll.u32 %v205_v9, 16 }
  0x73   : > { %2834 = vmatprep.mubr.msk.bf16.mxu0 %vm686_vm1, %v3294_v27  ;;  %v613_v27 = vrot.slane %v611_v35, 4 }
  0x74   : > { %2941 = vmatmul.mubr.msk.bf16.gmra.mrb[12].mxu1 %vm686_vm1, %v3378_v0 }
  0x75   : > { %2944 = vmatprep.mubr.msk.bf16.mxu1 %vm686_vm1, %v3393_v29 }
  0x7a   : > { %2835 = vmatmul.mubr.msk.bf16.gmra.mrb[8].mxu0 %vm686_vm1, %v3308_v50  ;;  %v622_v50 = vrot.slane %v620_v63, 5 }
  0x7b   : > { %2838 = vmatprep.mubr.msk.bf16.mxu0 %vm686_vm1, %v3337_v12  ;;  %v222_v12 = vld [vmem:[%s3229_s29 + $0xc8] sm:$0x1] }
  0x7c   : > { %2945 = vmatmul.mubr.msk.bf16.gmra.mrb[16].mxu1 %vm686_vm1, %v3419_v60 }
  0x7d   : > { %2948 = vmatprep.mubr.msk.bf16.mxu1 %vm686_vm1, %v3434_v4 }
  0x82   : > { %2839 = vmatmul.mubr.msk.bf16.gmra.mrb[12].mxu0 %vm686_vm1, %v3352_v36 }
  0x83   : > { %2842 = vmatprep.mubr.msk.bf16.mxu0 %vm686_vm1, %v3378_v0 }
  0x84   : > { %2949 = vmatmul.mubr.msk.bf16.gmra.mrb[20].mxu1 %vm686_vm1, %v3460_v5 }
  0x85   : > { %2952 = vmatprep.mubr.msk.bf16.mxu1 %vm686_vm1, %v3475_v43 }
  0x8a   : > { %2843 = vmatmul.mubr.msk.bf16.gmra.mrb[16].mxu0 %vm686_vm1, %v3393_v29 }
  0x8b   : > { %2846 = vmatprep.mubr.msk.bf16.mxu0 %vm686_vm1, %v3419_v60 }
  0x8c   : > { %2953 = vmatmul.mubr.msk.bf16.gmra.mrb[24].mxu1 %vm686_vm1, %v3497_v23 }
  0x8d   : > { %2956 = vmatprep.mubr.msk.bf16.mxu1 %vm686_vm1, %v3511_v58 }
  0x92   : > { %2847 = vmatmul.mubr.msk.bf16.gmra.mrb[20].mxu0 %vm686_vm1, %v3434_v4 }
  0x93   : > { %2850 = vmatprep.mubr.msk.bf16.mxu0 %vm686_vm1, %v3460_v5 }
  0x94   : > { %2957 = vmatmul.mubr.msk.bf16.gmra.mrb[28].mxu1 %vm686_vm1, %v2522_v20 }
  0x95   : > { %2962 = vmatprep.mubr.msk.bf16.mxu1 %vm686_vm1, %v3300_v34 }
  0x9a   : > { %2851 = vmatmul.mubr.msk.bf16.gmra.mrb[24].mxu0 %vm686_vm1, %v3475_v43 }
  0x9b   : > { %2854 = vmatprep.mubr.msk.bf16.mxu0 %vm686_vm1, %v3497_v23 }
  0x9c   : > { %2963 = vmatmul.mubr.msk.bf16.vlgmr.msra.gmra.mrb[0].mxu1 %vm686_vm1, %v3322_v10 }
  0x9d   : > { %2966 = vmatprep.mubr.msk.bf16.mxu1 %vm686_vm1, %v3344_v19 }
  0xa2   : > { %2855 = vmatmul.mubr.msk.bf16.gmra.mrb[28].mxu0 %vm686_vm1, %v3511_v58 }
  0xa3   : > { %2860 = vmatprep.mubr.msk.bf16.mxu0 %vm686_vm1, %v3279_v13  ;;  %v624_v13 = vshrl.u32 %v205_v9, 16 }
  0xa4   : > { %2967 = vmatmul.mubr.msk.bf16.gmra.mrb[4].mxu1 %vm686_vm1, %v3363_v52 }
  0xa5   : > { %2970 = vmatprep.mubr.msk.bf16.mxu1 %vm686_vm1, %v3385_v14 }
  0xaa   : > { %2861 = vmatmul.mubr.msk.bf16.vlgmr.msra.gmra.mrb[32].mxu0 %vm686_vm1, %v3300_v34  ;;  %v616_v34 = vrot.slane %v614_v42, 5 }
  0xab   : > { %2864 = vmatprep.mubr.msk.bf16.mxu0 %vm686_vm1, %v3322_v10  ;;  %v626_v10 = vrot.slane %v624_v13, 4 }
  0xac   : > { %2971 = vmatmul.mubr.msk.bf16.gmra.mrb[8].mxu1 %vm686_vm1, %v3406_v45 }
  0xad   : > { %2974 = vmatprep.mubr.msk.bf16.mxu1 %vm686_vm1, %v3426_v53  ;;  %v627_v36 = vor.u32 %v626_v10, %v622_v50 }
  0xb2   : > { %2865 = vmatmul.mubr.msk.bf16.gmra.mrb[36].mxu0 %vm686_vm1, %v3344_v19  ;;  %v617_v19 = vor.u32 %v616_v34, %v613_v27 }
  0xb3   : > { %2868 = vmatprep.mubr.msk.bf16.mxu0 %vm686_vm1, %v3363_v52  ;;  %v630_v52 = vshll.u32 %v222_v12, 16 }
  0xb4   : > { %2975 = vmatmul.mubr.msk.bf16.gmra.mrb[12].mxu1 %vm686_vm1, %v3447_v55  ;;  %v618_v0 = vrot.slane %v617_v19, 4 }
  0xb5   : > { %2978 = vmatprep.mubr.msk.bf16.mxu1 %vm686_vm1, %v3467_v2  ;;  %v632_v29 = vrot.slane %v630_v52, 5 }
  0xba   : > { %2869 = vmatmul.mubr.msk.bf16.gmra.mrb[40].mxu0 %vm686_vm1, %v3385_v14  ;;  %v628_v14 = vrot.slane %v627_v36, 4 }
  0xbb   : > { %2872 = vmatprep.mubr.msk.bf16.mxu0 %vm686_vm1, %v3406_v45  ;;  %v623_v45 = vsel %vm3260_vm4, %v618_v0, %v622_v50 }
  0xbc   : > { %2979 = vmatmul.mubr.msk.bf16.gmra.mrb[16].mxu1 %vm686_vm1, %v3488_v16  ;;  %v633_v60 = vsel %vm3260_vm4, %v628_v14, %v632_v29 }
  0xbd   : > { %2982 = vmatprep.mubr.msk.bf16.mxu1 %vm686_vm1, %v3504_v25 }
  0xc2   : > { %2873 = vmatmul.mubr.msk.bf16.gmra.mrb[44].mxu0 %vm686_vm1, %v3426_v53  ;;  %v2540_v53 = vcombine.low %v623_v45, %v633_v60 }
  0xc3   : > { %2876 = vmatprep.mubr.msk.bf16.mxu0 %vm686_vm1, %v3447_v55 }
  0xc4   : > { %2983 = vmatmul.mubr.msk.bf16.gmra.mrb[20].mxu1 %vm686_vm1, %v3522_v24 }
  0xc5   : > { %2986 = vmatprep.mubr.msk.bf16.mxu1 %vm686_vm1, %v3536_v57 }
  0xca   : > { %2877 = vmatmul.mubr.msk.bf16.gmra.mrb[48].mxu0 %vm686_vm1, %v3467_v2 }
  0xcb   : > { %2880 = vmatprep.mubr.msk.bf16.mxu0 %vm686_vm1, %v3488_v16 }
  0xcc   : > { %2987 = vmatmul.mubr.msk.bf16.gmra.mrb[24].mxu1 %vm686_vm1, %v3540_v54 }
  0xcd   : > { %2990 = vmatprep.mubr.msk.bf16.mxu1 %vm686_vm1, %v3555_v40 }
  0xd2   : > { %2881 = vmatmul.mubr.msk.bf16.gmra.mrb[52].mxu0 %vm686_vm1, %v3504_v25 }
  0xd3   : > { %2884 = vmatprep.mubr.msk.bf16.mxu0 %vm686_vm1, %v3522_v24 }
  0xd4   : > { %2991 = vmatmul.mubr.msk.bf16.gmra.mrb[28].mxu1 %vm686_vm1, %v2540_v53 }
  0xda   : > { %2885 = vmatmul.mubr.msk.bf16.gmra.mrb[56].mxu0 %vm686_vm1, %v3536_v57 }
  0xdb   : > { %2888 = vmatprep.mubr.msk.bf16.mxu0 %vm686_vm1, %v3540_v54 }
  0xe2   : > { %2889 = vmatmul.mubr.msk.bf16.gmra.mrb[60].mxu0 %vm686_vm1, %v3555_v40 }
 0x13d   : > { %v2828_v4 = vpop.f32.mrb[0].mxu0 }
 0x13e   : > { %v1200_v55 = vadd.f32 %v2828_v4, %v3690_v48  ;;  %v1065_v5 = vpop.f32.mrb[1].mxu0 }
 0x13f   : > { %v1198_v2 = vadd.f32 %v3690_v48, %v1065_v5  ;;  %v2829_v43 = vpop.f32.mrb[2].mxu0 }
 0x140   : > { %v2626_v16 = vpack.c.bf16 %v1200_v55, %v1200_v55  ;;  %v1201_v23 = vadd.f32 %v2829_v43, %v3690_v48  ;;  %v1068_v25 = vpop.f32.mrb[3].mxu0 }
 0x141   : > { %v2624_v58 = vpack.c.bf16 %v1198_v2, %v1198_v2  ;;  %v1199_v49 = vadd.f32 %v3690_v48, %v1068_v25 }
 0x142   : > { %1361 = vst.msk [vmem:[%s3697_s8 + $0x10] sm:$0xf] %vm1358_vm5, %v2626_v16  ;;  %v2627_v21 = vpack.c.bf16 %v1201_v23, %v1201_v23 }
 0x143   : > { %1359 = vst.msk [vmem:[%s3697_s8] sm:$0xf] %vm1358_vm5, %v2624_v58  ;;  %v2625_v6 = vpack.c.bf16 %v1199_v49, %v1199_v49 }
 0x144   : > { %1362 = vst.msk [vmem:[%s3697_s8 + $0x14] sm:$0xf] %vm1358_vm5, %v2627_v21 }
 0x145   : > { %1360 = vst.msk [vmem:[%s3697_s8 + $0x4] sm:$0xf] %vm1358_vm5, %v2625_v6  ;;  %v2832_v39 = vpop.f32.mrb[4].mxu0 }
 0x146   : > { %v1204_v17 = vadd.f32 %v2832_v39, %v3690_v48  ;;  %v1081_v3 = vpop.f32.mrb[5].mxu0 }
 0x147   : > { %v1202_v38 = vadd.f32 %v3690_v48, %v1081_v3  ;;  %v2833_v18 = vpop.f32.mrb[6].mxu0 }
 0x148   : > { %v2630_v24 = vpack.c.bf16 %v1204_v17, %v1204_v17  ;;  %v1205_v28 = vadd.f32 %v2833_v18, %v3690_v48  ;;  %v1084_v62 = vpop.f32.mrb[7].mxu0 }
 0x149   : > { %v2628_v31 = vpack.c.bf16 %v1202_v38, %v1202_v38  ;;  %v1203_v33 = vadd.f32 %v3690_v48, %v1084_v62 }
 0x14a   : > { %1365 = vst.msk [vmem:[%s3697_s8 + $0x30] sm:$0xf] %vm1358_vm5, %v2630_v24  ;;  %v2631_v59 = vpack.c.bf16 %v1205_v28, %v1205_v28 }
 0x14b   : > { %1363 = vst.msk [vmem:[%s3697_s8 + $0x20] sm:$0xf] %vm1358_vm5, %v2628_v31  ;;  %v2629_v1 = vpack.c.bf16 %v1203_v33, %v1203_v33 }
 0x14c   : > { %1366 = vst.msk [vmem:[%s3697_s8 + $0x34] sm:$0xf] %vm1358_vm5, %v2631_v59 }
 0x14d   : > { %1364 = vst.msk [vmem:[%s3697_s8 + $0x24] sm:$0xf] %vm1358_vm5, %v2629_v1  ;;  %v2836_v37 = vpop.f32.mrb[8].mxu0 }
 0x14e   : > { %v1208_v51 = vadd.f32 %v2836_v37, %v3690_v48  ;;  %v1097_v26 = vpop.f32.mrb[9].mxu0 }
 0x14f   : > { %v1206_v47 = vadd.f32 %v3690_v48, %v1097_v26  ;;  %v2837_v32 = vpop.f32.mrb[10].mxu0 }
 0x150   : > { %v2634_v61 = vpack.c.bf16 %v1208_v51, %v1208_v51  ;;  %v1209_v41 = vadd.f32 %v2837_v32, %v3690_v48  ;;  %v1100_v46 = vpop.f32.mrb[11].mxu0 }
 0x151   : > { %v2632_v44 = vpack.c.bf16 %v1206_v47, %v1206_v47  ;;  %v1207_v56 = vadd.f32 %v3690_v48, %v1100_v46 }
 0x152   : > { %1369 = vst.msk [vmem:[%s3697_s8 + $0x50] sm:$0xf] %vm1358_vm5, %v2634_v61  ;;  %v2635_v57 = vpack.c.bf16 %v1209_v41, %v1209_v41 }
 0x153   : > { %1367 = vst.msk [vmem:[%s3697_s8 + $0x40] sm:$0xf] %vm1358_vm5, %v2632_v44  ;;  %v2633_v30 = vpack.c.bf16 %v1207_v56, %v1207_v56 }
 0x154   : > { %1370 = vst.msk [vmem:[%s3697_s8 + $0x54] sm:$0xf] %vm1358_vm5, %v2635_v57 }
 0x155   : > { %1368 = vst.msk [vmem:[%s3697_s8 + $0x44] sm:$0xf] %vm1358_vm5, %v2633_v30  ;;  %v2840_v7 = vpop.f32.mrb[12].mxu0 }
 0x156   : > { %v1212_v54 = vadd.f32 %v2840_v7, %v3690_v48  ;;  %v1113_v11 = vpop.f32.mrb[13].mxu0 }
 0x157   : > { %v1210_v22 = vadd.f32 %v3690_v48, %v1113_v11  ;;  %v2841_v15 = vpop.f32.mrb[14].mxu0 }
 0x158   : > { %v2638_v40 = vpack.c.bf16 %v1212_v54, %v1212_v54  ;;  %v1213_v8 = vadd.f32 %v2841_v15, %v3690_v48  ;;  %v1116_v9 = vpop.f32.mrb[15].mxu0 }
 0x159   : > { %v2636_v20 = vpack.c.bf16 %v1210_v22, %v1210_v22  ;;  %v1211_v35 = vadd.f32 %v3690_v48, %v1116_v9 }
 0x15a   : > { %1373 = vst.msk [vmem:[%s3697_s8 + $0x70] sm:$0xf] %vm1358_vm5, %v2638_v40  ;;  %v2639_v42 = vpack.c.bf16 %v1213_v8, %v1213_v8 }
 0x15b   : > { %1371 = vst.msk [vmem:[%s3697_s8 + $0x60] sm:$0xf] %vm1358_vm5, %v2636_v20  ;;  %v2637_v63 = vpack.c.bf16 %v1211_v35, %v1211_v35 }
 0x15c   : > { %1374 = vst.msk [vmem:[%s3697_s8 + $0x74] sm:$0xf] %vm1358_vm5, %v2639_v42 }
 0x15d   : > { %1372 = vst.msk [vmem:[%s3697_s8 + $0x64] sm:$0xf] %vm1358_vm5, %v2637_v63  ;;  %v2844_v13 = vpop.f32.mrb[16].mxu0 }
 0x15e   : > { %v1216_v27 = vadd.f32 %v2844_v13, %v3690_v48  ;;  %v1129_v34 = vpop.f32.mrb[17].mxu0 }
 0x15f   : > { %v1214_v50 = vadd.f32 %v3690_v48, %v1129_v34  ;;  %v2845_v10 = vpop.f32.mrb[18].mxu0 }
 0x160   : > { %v2642_v12 = vpack.c.bf16 %v1216_v27, %v1216_v27  ;;  %v1217_v19 = vadd.f32 %v2845_v10, %v3690_v48  ;;  %v1132_v36 = vpop.f32.mrb[19].mxu0 }
 0x161   : > { %v2640_v52 = vpack.c.bf16 %v1214_v50, %v1214_v50  ;;  %v1215_v0 = vadd.f32 %v3690_v48, %v1132_v36 }
 0x162   : > { %1377 = vst.msk [vmem:[%s3697_s8 + $0x90] sm:$0xf] %vm1358_vm5, %v2642_v12  ;;  %v2643_v14 = vpack.c.bf16 %v1217_v19, %v1217_v19 }
 0x163   : > { %1375 = vst.msk [vmem:[%s3697_s8 + $0x80] sm:$0xf] %vm1358_vm5, %v2640_v52  ;;  %v2641_v29 = vpack.c.bf16 %v1215_v0, %v1215_v0 }
 0x164   : > { %1378 = vst.msk [vmem:[%s3697_s8 + $0x94] sm:$0xf] %vm1358_vm5, %v2643_v14 }
 0x165   : > { %1376 = vst.msk [vmem:[%s3697_s8 + $0x84] sm:$0xf] %vm1358_vm5, %v2641_v29  ;;  %v2848_v45 = vpop.f32.mrb[20].mxu0 }
 0x166   : > { %v1220_v60 = vadd.f32 %v2848_v45, %v3690_v48  ;;  %v1145_v53 = vpop.f32.mrb[21].mxu0 }
 0x167   : > { %v1218_v4 = vadd.f32 %v3690_v48, %v1145_v53  ;;  %v2849_v55 = vpop.f32.mrb[22].mxu0 }
 0x168   : > { %v2646_v5 = vpack.c.bf16 %v1220_v60, %v1220_v60  ;;  %v1221_v2 = vadd.f32 %v2849_v55, %v3690_v48  ;;  %v1148_v43 = vpop.f32.mrb[23].mxu0 }
 0x169   : > { %v2644_v16 = vpack.c.bf16 %v1218_v4, %v1218_v4  ;;  %v1219_v23 = vadd.f32 %v3690_v48, %v1148_v43 }
 0x16a   : > { %1381 = vst.msk [vmem:[%s3697_s8 + $0xb0] sm:$0xf] %vm1358_vm5, %v2646_v5  ;;  %v2647_v25 = vpack.c.bf16 %v1221_v2, %v1221_v2 }
 0x16b   : > { %1379 = vst.msk [vmem:[%s3697_s8 + $0xa0] sm:$0xf] %vm1358_vm5, %v2644_v16  ;;  %v2645_v58 = vpack.c.bf16 %v1219_v23, %v1219_v23 }
 0x16c   : > { %1382 = vst.msk [vmem:[%s3697_s8 + $0xb4] sm:$0xf] %vm1358_vm5, %v2647_v25 }
 0x16d   : > { %1380 = vst.msk [vmem:[%s3697_s8 + $0xa4] sm:$0xf] %vm1358_vm5, %v2645_v58  ;;  %v2852_v49 = vpop.f32.mrb[24].mxu0 }
 0x16e   : > { %v1224_v21 = vadd.f32 %v2852_v49, %v3690_v48  ;;  %v1161_v6 = vpop.f32.mrb[25].mxu0 }
 0x16f   : > { %v1222_v39 = vadd.f32 %v3690_v48, %v1161_v6  ;;  %v2853_v17 = vpop.f32.mrb[26].mxu0  ;;  %v2964_v3 = vpop.f32.mrb[0].mxu1 }
 0x170   : > { %v2650_v38 = vpack.c.bf16 %v1224_v21, %v1224_v21  ;;  %v1225_v18 = vadd.f32 %v2853_v17, %v3690_v48  ;;  %v1164_v24 = vpop.f32.mrb[27].mxu0  ;;  %v1974_v28 = vpop.f32.mrb[1].mxu1 }
 0x171   : > { %v2648_v62 = vpack.c.bf16 %v1222_v39, %v1222_v39  ;;  %v1223_v31 = vadd.f32 %v3690_v48, %v1164_v24  ;;  %v2965_v33 = vpop.f32.mrb[2].mxu1 }
 0x172   : > { %1385 = vst.msk [vmem:[%s3697_s8 + $0xd0] sm:$0xf] %vm1358_vm5, %v2650_v38  ;;  %v2651_v59 = vpack.c.bf16 %v1225_v18, %v1225_v18  ;;  %v1977_v1 = vpop.f32.mrb[3].mxu1 }
 0x173   : > { %1383 = vst.msk [vmem:[%s3697_s8 + $0xc0] sm:$0xf] %vm1358_vm5, %v2648_v62  ;;  %v2649_v37 = vpack.c.bf16 %v1223_v31, %v1223_v31 }
 0x174   : > { %1386 = vst.msk [vmem:[%s3697_s8 + $0xd4] sm:$0xf] %vm1358_vm5, %v2651_v59 }
 0x175   : > { %1384 = vst.msk [vmem:[%s3697_s8 + $0xc4] sm:$0xf] %vm1358_vm5, %v2649_v37  ;;  %v2856_v51 = vpop.f32.mrb[28].mxu0 }
 0x176   : > { %v1228_v26 = vadd.f32 %v2856_v51, %v3690_v48  ;;  %v1177_v47 = vpop.f32.mrb[29].mxu0 }
 0x177   : > { %v1226_v32 = vadd.f32 %v3690_v48, %v1177_v47  ;;  %v2857_v61 = vpop.f32.mrb[30].mxu0  ;;  %v2968_v41 = vpop.f32.mrb[4].mxu1 }
 0x178   : > { %v2654_v46 = vpack.c.bf16 %v1228_v26, %v1228_v26  ;;  %v1229_v44 = vadd.f32 %v2857_v61, %v3690_v48  ;;  %v1180_v56 = vpop.f32.mrb[31].mxu0  ;;  %v1990_v57 = vpop.f32.mrb[5].mxu1 }
 0x179   : > { %v2652_v30 = vpack.c.bf16 %v1226_v32, %v1226_v32  ;;  %v1227_v7 = vadd.f32 %v3690_v48, %v1180_v56  ;;  %v2969_v54 = vpop.f32.mrb[6].mxu1 }
 0x17a   : > { %1389 = vst.msk [vmem:[%s3697_s8 + $0xf0] sm:$0xf] %vm1358_vm5, %v2654_v46  ;;  %v2655_v11 = vpack.c.bf16 %v1229_v44, %v1229_v44  ;;  %v1993_v22 = vpop.f32.mrb[7].mxu1 }
 0x17b   : > { %1387 = vst.msk [vmem:[%s3697_s8 + $0xe0] sm:$0xf] %vm1358_vm5, %v2652_v30  ;;  %v2653_v15 = vpack.c.bf16 %v1227_v7, %v1227_v7 }
 0x17c   : > { %1390 = vst.msk [vmem:[%s3697_s8 + $0xf4] sm:$0xf] %vm1358_vm5, %v2655_v11 }
 0x17d   : > { %1388 = vst.msk [vmem:[%s3697_s8 + $0xe4] sm:$0xf] %vm1358_vm5, %v2653_v15  ;;  %v2862_v40 = vpop.f32.mrb[32].mxu0 }
 0x17e   : > { %v2994_v8 = vadd.f32 %v2964_v3, %v2862_v40  ;;  %v1432_v9 = vpop.f32.mrb[33].mxu0 }
 0x17f   : > { %v2995_v20 = vadd.f32 %v1974_v28, %v1432_v9  ;;  %v2863_v35 = vpop.f32.mrb[34].mxu0  ;;  %v2972_v42 = vpop.f32.mrb[8].mxu1 }
 0x180   : > { %v2135_v63 = vadd.f32 %v2994_v8, %v3690_v48  ;;  %v2996_v13 = vadd.f32 %v2965_v33, %v2863_v35  ;;  %v1435_v27 = vpop.f32.mrb[35].mxu0  ;;  %v2006_v34 = vpop.f32.mrb[9].mxu1 }
 0x181   : > { %v2133_v50 = vadd.f32 %v2995_v20, %v3690_v48  ;;  %v2997_v10 = vadd.f32 %v1977_v1, %v1435_v27  ;;  %v2973_v12 = vpop.f32.mrb[10].mxu1 }
 0x182   : > { %v2658_v19 = vpack.c.bf16 %v2135_v63, %v2135_v63  ;;  %v2136_v36 = vadd.f32 %v2996_v13, %v3690_v48  ;;  %v2009_v52 = vpop.f32.mrb[11].mxu1 }
 0x183   : > { %v2656_v0 = vpack.c.bf16 %v2133_v50, %v2133_v50  ;;  %v2134_v14 = vadd.f32 %v2997_v10, %v3690_v48 }
 0x184   : > { %2591 = vst.msk [vmem:[%s3697_s8 + $0x18] sm:$0xf] %vm1358_vm5, %v2658_v19  ;;  %v2659_v29 = vpack.c.bf16 %v2136_v36, %v2136_v36 }
 0x185   : > { %2589 = vst.msk [vmem:[%s3697_s8 + $0x8] sm:$0xf] %vm1358_vm5, %v2656_v0  ;;  %v2657_v45 = vpack.c.bf16 %v2134_v14, %v2134_v14  ;;  %v2866_v60 = vpop.f32.mrb[36].mxu0 }
 0x186   : > { %2592 = vst.msk [vmem:[%s3697_s8 + $0x1c] sm:$0xf] %vm1358_vm5, %v2659_v29  ;;  %v2998_v53 = vadd.f32 %v2968_v41, %v2866_v60  ;;  %v1448_v4 = vpop.f32.mrb[37].mxu0 }
 0x187   : > { %2590 = vst.msk [vmem:[%s3697_s8 + $0xc] sm:$0xf] %vm1358_vm5, %v2657_v45  ;;  %v2999_v55 = vadd.f32 %v1990_v57, %v1448_v4  ;;  %v2867_v5 = vpop.f32.mrb[38].mxu0  ;;  %v2976_v2 = vpop.f32.mrb[12].mxu1 }
 0x188   : > { %v2139_v43 = vadd.f32 %v2998_v53, %v3690_v48  ;;  %v3000_v16 = vadd.f32 %v2969_v54, %v2867_v5  ;;  %v1451_v23 = vpop.f32.mrb[39].mxu0  ;;  %v2022_v25 = vpop.f32.mrb[13].mxu1 }
 0x189   : > { %v2137_v58 = vadd.f32 %v2999_v55, %v3690_v48  ;;  %v3001_v49 = vadd.f32 %v1993_v22, %v1451_v23  ;;  %v2977_v21 = vpop.f32.mrb[14].mxu1 }
 0x18a   : > { %v2662_v6 = vpack.c.bf16 %v2139_v43, %v2139_v43  ;;  %v2140_v39 = vadd.f32 %v3000_v16, %v3690_v48  ;;  %v2025_v17 = vpop.f32.mrb[15].mxu1 }
 0x18b   : > { %v2660_v3 = vpack.c.bf16 %v2137_v58, %v2137_v58  ;;  %v2138_v38 = vadd.f32 %v3001_v49, %v3690_v48 }
 0x18c   : > { %2595 = vst.msk [vmem:[%s3697_s8 + $0x38] sm:$0xf] %vm1358_vm5, %v2662_v6  ;;  %v2663_v18 = vpack.c.bf16 %v2140_v39, %v2140_v39 }
 0x18d   : > { %2593 = vst.msk [vmem:[%s3697_s8 + $0x28] sm:$0xf] %vm1358_vm5, %v2660_v3  ;;  %v2661_v24 = vpack.c.bf16 %v2138_v38, %v2138_v38  ;;  %v2870_v28 = vpop.f32.mrb[40].mxu0 }
 0x18e   : > { %2596 = vst.msk [vmem:[%s3697_s8 + $0x3c] sm:$0xf] %vm1358_vm5, %v2663_v18  ;;  %v3002_v62 = vadd.f32 %v2972_v42, %v2870_v28  ;;  %v1464_v31 = vpop.f32.mrb[41].mxu0 }
 0x18f   : > { %2594 = vst.msk [vmem:[%s3697_s8 + $0x2c] sm:$0xf] %vm1358_vm5, %v2661_v24  ;;  %v3003_v33 = vadd.f32 %v2006_v34, %v1464_v31  ;;  %v2871_v59 = vpop.f32.mrb[42].mxu0  ;;  %v2980_v1 = vpop.f32.mrb[16].mxu1 }
 0x190   : > { %v2143_v37 = vadd.f32 %v3002_v62, %v3690_v48  ;;  %v3004_v51 = vadd.f32 %v2973_v12, %v2871_v59  ;;  %v1467_v26 = vpop.f32.mrb[43].mxu0  ;;  %v2038_v47 = vpop.f32.mrb[17].mxu1 }
 0x191   : > { %v2141_v32 = vadd.f32 %v3003_v33, %v3690_v48  ;;  %v3005_v61 = vadd.f32 %v2009_v52, %v1467_v26  ;;  %v2981_v41 = vpop.f32.mrb[18].mxu1 }
 0x192   : > { %v2666_v46 = vpack.c.bf16 %v2143_v37, %v2143_v37  ;;  %v2144_v44 = vadd.f32 %v3004_v51, %v3690_v48  ;;  %v2041_v56 = vpop.f32.mrb[19].mxu1 }
 0x193   : > { %v2664_v57 = vpack.c.bf16 %v2141_v32, %v2141_v32  ;;  %v2142_v30 = vadd.f32 %v3005_v61, %v3690_v48 }
 0x194   : > { %2599 = vst.msk [vmem:[%s3697_s8 + $0x58] sm:$0xf] %vm1358_vm5, %v2666_v46  ;;  %v2667_v7 = vpack.c.bf16 %v2144_v44, %v2144_v44 }
 0x195   : > { %2597 = vst.msk [vmem:[%s3697_s8 + $0x48] sm:$0xf] %vm1358_vm5, %v2664_v57  ;;  %v2665_v54 = vpack.c.bf16 %v2142_v30, %v2142_v30  ;;  %v2874_v11 = vpop.f32.mrb[44].mxu0 }
 0x196   : > { %2600 = vst.msk [vmem:[%s3697_s8 + $0x5c] sm:$0xf] %vm1358_vm5, %v2667_v7  ;;  %v3006_v22 = vadd.f32 %v2976_v2, %v2874_v11  ;;  %v1480_v15 = vpop.f32.mrb[45].mxu0 }
 0x197   : > { %2598 = vst.msk [vmem:[%s3697_s8 + $0x4c] sm:$0xf] %vm1358_vm5, %v2665_v54  ;;  %v3007_v40 = vadd.f32 %v2022_v25, %v1480_v15  ;;  %v2875_v8 = vpop.f32.mrb[46].mxu0  ;;  %v2984_v9 = vpop.f32.mrb[20].mxu1 }
 0x198   : > { %v2147_v20 = vadd.f32 %v3006_v22, %v3690_v48  ;;  %v3008_v35 = vadd.f32 %v2977_v21, %v2875_v8  ;;  %v1483_v42 = vpop.f32.mrb[47].mxu0  ;;  %v2054_v63 = vpop.f32.mrb[21].mxu1 }
 0x199   : > { %v2145_v13 = vadd.f32 %v3007_v40, %v3690_v48  ;;  %v3009_v27 = vadd.f32 %v2025_v17, %v1483_v42  ;;  %v2985_v34 = vpop.f32.mrb[22].mxu1 }
 0x19a   : > { %v2670_v50 = vpack.c.bf16 %v2147_v20, %v2147_v20  ;;  %v2148_v10 = vadd.f32 %v3008_v35, %v3690_v48  ;;  %v2057_v12 = vpop.f32.mrb[23].mxu1 }
 0x19b   : > { %v2668_v19 = vpack.c.bf16 %v2145_v13, %v2145_v13  ;;  %v2146_v36 = vadd.f32 %v3009_v27, %v3690_v48 }
 0x19c   : > { %2603 = vst.msk [vmem:[%s3697_s8 + $0x78] sm:$0xf] %vm1358_vm5, %v2670_v50  ;;  %v2671_v52 = vpack.c.bf16 %v2148_v10, %v2148_v10 }
 0x19d   : > { %2601 = vst.msk [vmem:[%s3697_s8 + $0x68] sm:$0xf] %vm1358_vm5, %v2668_v19  ;;  %v2669_v0 = vpack.c.bf16 %v2146_v36, %v2146_v36  ;;  %v2878_v14 = vpop.f32.mrb[48].mxu0 }
 0x19e   : > { %2604 = vst.msk [vmem:[%s3697_s8 + $0x7c] sm:$0xf] %vm1358_vm5, %v2671_v52  ;;  %v3010_v29 = vadd.f32 %v2980_v1, %v2878_v14  ;;  %v1496_v45 = vpop.f32.mrb[49].mxu0 }
 0x19f   : > { %2602 = vst.msk [vmem:[%s3697_s8 + $0x6c] sm:$0xf] %vm1358_vm5, %v2669_v0  ;;  %v3011_v60 = vadd.f32 %v2038_v47, %v1496_v45  ;;  %v2879_v53 = vpop.f32.mrb[50].mxu0  ;;  %v2988_v4 = vpop.f32.mrb[24].mxu1 }
 0x1a0   : > { %v2151_v55 = vadd.f32 %v3010_v29, %v3690_v48  ;;  %v3012_v5 = vadd.f32 %v2981_v41, %v2879_v53  ;;  %v1499_v2 = vpop.f32.mrb[51].mxu0  ;;  %v2070_v43 = vpop.f32.mrb[25].mxu1 }
 0x1a1   : > { %v2149_v16 = vadd.f32 %v3011_v60, %v3690_v48  ;;  %v3013_v23 = vadd.f32 %v2041_v56, %v1499_v2  ;;  %v2989_v25 = vpop.f32.mrb[26].mxu1 }
 0x1a2   : > { %v2674_v58 = vpack.c.bf16 %v2151_v55, %v2151_v55  ;;  %v2152_v49 = vadd.f32 %v3012_v5, %v3690_v48  ;;  %v2073_v21 = vpop.f32.mrb[27].mxu1 }
 0x1a3   : > { %v2672_v6 = vpack.c.bf16 %v2149_v16, %v2149_v16  ;;  %v2150_v39 = vadd.f32 %v3013_v23, %v3690_v48 }
 0x1a4   : > { %2607 = vst.msk [vmem:[%s3697_s8 + $0x98] sm:$0xf] %vm1358_vm5, %v2674_v58  ;;  %v2675_v17 = vpack.c.bf16 %v2152_v49, %v2152_v49 }
 0x1a5   : > { %2605 = vst.msk [vmem:[%s3697_s8 + $0x88] sm:$0xf] %vm1358_vm5, %v2672_v6  ;;  %v2673_v3 = vpack.c.bf16 %v2150_v39, %v2150_v39  ;;  %v2882_v38 = vpop.f32.mrb[52].mxu0 }
 0x1a6   : > { %2608 = vst.msk [vmem:[%s3697_s8 + $0x9c] sm:$0xf] %vm1358_vm5, %v2675_v17  ;;  %v3014_v18 = vadd.f32 %v2984_v9, %v2882_v38  ;;  %v1512_v24 = vpop.f32.mrb[53].mxu0 }
 0x1a7   : > { %2606 = vst.msk [vmem:[%s3697_s8 + $0x8c] sm:$0xf] %vm1358_vm5, %v2673_v3  ;;  %v3015_v28 = vadd.f32 %v2054_v63, %v1512_v24  ;;  %v2883_v62 = vpop.f32.mrb[54].mxu0  ;;  %v2992_v31 = vpop.f32.mrb[28].mxu1 }
 0x1a8   : > { %v2155_v33 = vadd.f32 %v3014_v18, %v3690_v48  ;;  %v3016_v59 = vadd.f32 %v2985_v34, %v2883_v62  ;;  %v1515_v1 = vpop.f32.mrb[55].mxu0  ;;  %v2086_v37 = vpop.f32.mrb[29].mxu1 }
 0x1a9   : > { %v2153_v51 = vadd.f32 %v3015_v28, %v3690_v48  ;;  %v3017_v26 = vadd.f32 %v2057_v12, %v1515_v1  ;;  %v2993_v47 = vpop.f32.mrb[30].mxu1 }
 0x1aa   : > { %v2678_v32 = vpack.c.bf16 %v2155_v33, %v2155_v33  ;;  %v2156_v61 = vadd.f32 %v3016_v59, %v3690_v48  ;;  %v2089_v41 = vpop.f32.mrb[31].mxu1 }
 0x1ab   : > { %v2676_v46 = vpack.c.bf16 %v2153_v51, %v2153_v51  ;;  %v2154_v44 = vadd.f32 %v3017_v26, %v3690_v48 }
 0x1ac   : > { %2611 = vst.msk [vmem:[%s3697_s8 + $0xb8] sm:$0xf] %vm1358_vm5, %v2678_v32  ;;  %v2679_v56 = vpack.c.bf16 %v2156_v61, %v2156_v61 }
 0x1ad   : > { %2609 = vst.msk [vmem:[%s3697_s8 + $0xa8] sm:$0xf] %vm1358_vm5, %v2676_v46  ;;  %v2677_v57 = vpack.c.bf16 %v2154_v44, %v2154_v44  ;;  %v2886_v30 = vpop.f32.mrb[56].mxu0 }
 0x1ae   : > { %2612 = vst.msk [vmem:[%s3697_s8 + $0xbc] sm:$0xf] %vm1358_vm5, %v2679_v56  ;;  %v3018_v7 = vadd.f32 %v2988_v4, %v2886_v30  ;;  %v1528_v54 = vpop.f32.mrb[57].mxu0 }
 0x1af   : > { %2610 = vst.msk [vmem:[%s3697_s8 + $0xac] sm:$0xf] %vm1358_vm5, %v2677_v57  ;;  %v3019_v11 = vadd.f32 %v2070_v43, %v1528_v54  ;;  %v2887_v22 = vpop.f32.mrb[58].mxu0 }
 0x1b0   : > { %v2159_v15 = vadd.f32 %v3018_v7, %v3690_v48  ;;  %v3020_v40 = vadd.f32 %v2989_v25, %v2887_v22  ;;  %v1531_v8 = vpop.f32.mrb[59].mxu0 }
 0x1b1   : > { %v2157_v9 = vadd.f32 %v3019_v11, %v3690_v48  ;;  %v3021_v20 = vadd.f32 %v2073_v21, %v1531_v8 }
 0x1b2   : > { %v2682_v35 = vpack.c.bf16 %v2159_v15, %v2159_v15  ;;  %v2160_v42 = vadd.f32 %v3020_v40, %v3690_v48 }
 0x1b3   : > { %v2680_v63 = vpack.c.bf16 %v2157_v9, %v2157_v9  ;;  %v2158_v13 = vadd.f32 %v3021_v20, %v3690_v48 }
 0x1b4   : > { %2615 = vst.msk [vmem:[%s3697_s8 + $0xd8] sm:$0xf] %vm1358_vm5, %v2682_v35  ;;  %v2683_v27 = vpack.c.bf16 %v2160_v42, %v2160_v42 }
 0x1b5   : > { %2613 = vst.msk [vmem:[%s3697_s8 + $0xc8] sm:$0xf] %vm1358_vm5, %v2680_v63  ;;  %v2681_v34 = vpack.c.bf16 %v2158_v13, %v2158_v13  ;;  %v2890_v50 = vpop.f32.mrb[60].mxu0 }
 0x1b6   : > { %2616 = vst.msk [vmem:[%s3697_s8 + $0xdc] sm:$0xf] %vm1358_vm5, %v2683_v27  ;;  %v3022_v10 = vadd.f32 %v2992_v31, %v2890_v50  ;;  %v1544_v12 = vpop.f32.mrb[61].mxu0 }
 0x1b7   : > { %2614 = vst.msk [vmem:[%s3697_s8 + $0xcc] sm:$0xf] %vm1358_vm5, %v2681_v34  ;;  %v3023_v19 = vadd.f32 %v2086_v37, %v1544_v12  ;;  %v2891_v36 = vpop.f32.mrb[62].mxu0 }
 0x1b8   : > { %v2163_v52 = vadd.f32 %v3022_v10, %v3690_v48  ;;  %v3024_v0 = vadd.f32 %v2993_v47, %v2891_v36  ;;  %v1547_v14 = vpop.f32.mrb[63].mxu0 }
 0x1b9   : > { %v2161_v29 = vadd.f32 %v3023_v19, %v3690_v48  ;;  %v3025_v45 = vadd.f32 %v2089_v41, %v1547_v14 }
 0x1ba   : > { %v2686_v60 = vpack.c.bf16 %v2163_v52, %v2163_v52  ;;  %v2164_v53 = vadd.f32 %v3024_v0, %v3690_v48 }
 0x1bb   : > { %v2684_v4 = vpack.c.bf16 %v2161_v29, %v2161_v29  ;;  %v2162_v55 = vadd.f32 %v3025_v45, %v3690_v48 }
 0x1bc   : > { %2619 = vst.msk [vmem:[%s3697_s8 + $0xf8] sm:$0xf] %vm1358_vm5, %v2686_v60  ;;  %v2687_v5 = vpack.c.bf16 %v2164_v53, %v2164_v53 }
 0x1bd   : > { %2617 = vst.msk [vmem:[%s3697_s8 + $0xe8] sm:$0xf] %vm1358_vm5, %v2684_v4  ;;  %v2685_v2 = vpack.c.bf16 %v2162_v55, %v2162_v55 }
 0x1be   : > { %2620 = vst.msk [vmem:[%s3697_s8 + $0xfc] sm:$0xf] %vm1358_vm5, %v2687_v5 }
 0x1bf   : > { %2618 = vst.msk [vmem:[%s3697_s8 + $0xec] sm:$0xf] %vm1358_vm5, %v2685_v2 }
 0x1c0 PF: > { %s13_s12 = sadd.s32 1, %s3160_s12  }
 0x1c1   : > { %p10_p4 = scmp.ge.s32.totalorder %s13_s12, 4  }
 0x1c3   :  { %12 = sbr.rel (!%p10_p4) target bundleno = 1 (0x1), region = 68 }

</bundles_post_ra>
